<compile_context>
chip_gen: v7x
topology: tpu7x:2x2x1
jax: 0.10.0
libtpu: 0.0.40
codegen_flags: <defaults>
</compile_context>

<pallas_src>
import functools

import jax
import jax.numpy as jnp
from jax.experimental import pallas as pl
from jax.experimental.pallas import tpu as pltpu


def _sinegmoid(z, delta1, delta2):
    # sin(d1*z) * sigmoid(d2*z); sigmoid via tanh -> EUP slot (no exp+divide
    # on the VALU).
    return jnp.sin(delta1 * z) * (0.5 * (jnp.tanh(0.5 * delta2 * z) + 1.0))


def _hdnn_kernel(t_ref, w1_ref, b1_ref, wh_ref, bh_ref, wo_ref, bo_ref, o_ref,
                 *, n_hid_layers, delta1, delta2):
    f32 = jnp.float32
    tp = t_ref[...].astype(f32)                       # (tile_rows, G)

    # First layer. theta is already folded into b1, and W1 row 0 is laid out
    # block-diagonally, so the packed tile is one small MXU push:
    #   (tile_rows, G) @ (G, G*D_hid) + b1_tiled
    h = jnp.dot(tp, w1_ref[...].astype(f32), preferred_element_type=f32)
    h = h + b1_ref[...].astype(f32)                   # (tile_rows, G*D_hid)
    h = _sinegmoid(h, delta1, delta2)

    wh = wh_ref[...].astype(f32)                      # (G*D_hid, G*D_hid) blk-diag
    bh = bh_ref[...].astype(f32)                      # (1, G*D_hid)
    for _ in range(n_hid_layers):                     # hidn - 1 (static, small)
        h = jnp.dot(h, wh, preferred_element_type=f32) + bh
        h = _sinegmoid(h, delta1, delta2)

    r = jnp.dot(h, wo_ref[...].astype(f32), preferred_element_type=f32)
    r = r + bo_ref[...].astype(f32)                   # (tile_rows, G*outn)
    o_ref[...] = r.astype(o_ref.dtype)


def _block_diag(mat, g):
    """(a, b) -> (g*a, g*b) block-diagonal with `mat` repeated on the diagonal."""
    a, b = mat.shape
    eye = jnp.eye(g, dtype=mat.dtype)
    return (eye[:, None, :, None] * mat[None, :, None, :]).reshape(g * a, g * b)


def _default_group(d_hid):
    """Pack enough samples to fill ~256 lanes (128 on v5e's 4x128 MXU)."""
    target_lanes = 256
    try:
        kind = jax.devices()[0].device_kind.lower()
        if "v5 lite" in kind or "v5e" in kind or "v5litepod" in kind:
            target_lanes = 128
    except Exception:
        pass
    return max(1, target_lanes // max(1, d_hid))


def _pick_row_tile(rows, target=2048):
    """Row tile (multiple of 8) and padded row count (multiple of the tile,
    always >= 2 tiles so the parallel grid axis can use both v7x TensorCores
    and the DMA/compute pipeline is never degenerate)."""
    tile = max(8, min(target, (rows // 2 // 8) * 8))
    padded = max(2 * tile, ((rows + tile - 1) // tile) * tile)
    return tile, padded


def hdnn_forward(t, theta, params, *, hidn, delta1, delta2,
                 group=None, row_tile_target=2048):
    """Pallas implementation of HDNN.forward(t, theta).

    params (weights pre-transposed so y = x @ W + b):
      w1: (2, D_hid)     b1: (D_hid,)
      wh: (D_hid, D_hid) bh: (D_hid,)
      wo: (D_hid, outn)  bo: (outn,)
    theta is the scalar pendulum mass (the module broadcasts it via ones*theta).
    Returns a list of (N, 1) arrays, one per output column (like the module).
    """
    t = jnp.asarray(t)
    if t.ndim == 1:
        t = t[:, None]
    n = t.shape[0]
    dtype = t.dtype

    w1, b1 = params["w1"], params["b1"]
    wh, bh = params["wh"], params["bh"]
    wo, bo = params["wo"], params["bo"]
    inpn, d_hid = w1.shape
    outn = wo.shape[1]
    assert inpn == 2, "HDNN input is cat([t, ones*theta], 1) -> inpn == 2"

    # Fold the scalar theta into the first-layer bias (removes the whole
    # ones*theta input stream):
    #   cat([t, ones*theta]) @ W1 + b1 == t * W1[0,:] + (theta * W1[1,:] + b1)
    theta = jnp.asarray(theta, dtype=w1.dtype)
    b1_eff = theta * w1[1, :] + b1                    # (D_hid,)

    g = group if group is not None else _default_group(d_hid)

    # Lane-pack g consecutive samples per packed row (pure reshape) and build
    # block-diagonal weights once so every layer contracts g*D_hid lanes.
    rows = (n + g - 1) // g
    tile_rows, rows_pad = _pick_row_tile(rows, row_tile_target)
    n_pad = rows_pad * g
    t_flat = t[:, 0]
    if n_pad != n:
        t_flat = jnp.pad(t_flat, (0, n_pad - n))
    t_packed = t_flat.reshape(rows_pad, g)            # (rows_pad, G)

    w1_bd = _block_diag(w1[0:1, :], g)                # (G, G*D_hid)
    b1_bd = jnp.tile(b1_eff, g).reshape(1, g * d_hid)
    wh_bd = _block_diag(wh, g)                        # (G*D_hid, G*D_hid)
    bh_bd = jnp.tile(bh, g).reshape(1, g * d_hid)
    wo_bd = _block_diag(wo, g)                        # (G*D_hid, G*outn)
    bo_bd = jnp.tile(bo, g).reshape(1, g * outn)

    grid = (rows_pad // tile_rows,)

    # Advisory scheduling hint (logical, un-padded work).
    flops = int(n * (2 * inpn * d_hid + (hidn - 1) * 2 * d_hid * d_hid
                     + 2 * d_hid * outn))
    transcendentals = int(n * d_hid * 2 * hidn)       # sin + tanh per activation
    bytes_accessed = int(4 * (n + n * outn + w1_bd.size + b1_bd.size
                              + wh_bd.size + bh_bd.size + wo_bd.size
                              + bo_bd.size))

    kernel = functools.partial(
        _hdnn_kernel, n_hid_layers=hidn - 1,
        delta1=float(delta1), delta2=float(delta2))

    r_packed = pl.pallas_call(
        kernel,
        out_shape=jax.ShapeDtypeStruct((rows_pad, g * outn), dtype),
        grid=grid,
        in_specs=[
            pl.BlockSpec((tile_rows, g), lambda i: (i, 0)),          # packed t
            pl.BlockSpec((g, g * d_hid), lambda i: (0, 0)),          # W1 blk-diag
            pl.BlockSpec((1, g * d_hid), lambda i: (0, 0)),          # b1_eff tiled
            pl.BlockSpec((g * d_hid, g * d_hid), lambda i: (0, 0)),  # W_hid blk-diag
            pl.BlockSpec((1, g * d_hid), lambda i: (0, 0)),          # b_hid tiled
            pl.BlockSpec((g * d_hid, g * outn), lambda i: (0, 0)),   # W_out blk-diag
            pl.BlockSpec((1, g * outn), lambda i: (0, 0)),           # b_out tiled
        ],
        out_specs=pl.BlockSpec((tile_rows, g * outn), lambda i: (i, 0)),
        compiler_params=pltpu.CompilerParams(
            dimension_semantics=("parallel",)),
        cost_estimate=pl.CostEstimate(
            flops=flops, transcendentals=transcendentals,
            bytes_accessed=bytes_accessed),
    )(t_packed, w1_bd, b1_bd, wh_bd, bh_bd, wo_bd, bo_bd)

    # (rows_pad, G*outn) -> (N_pad, outn) is a pure reshape (packing is by
    # consecutive samples); drop the padded rows, then split columns like the
    # PyTorch module.
    r = r_packed.reshape(n_pad, outn)[:n]
    return [r[:, i].reshape(-1, 1) for i in range(outn)]


def hdnn_reference(t, theta, params, *, hidn, delta1, delta2):
    """Plain-JAX reference matching the PyTorch forward semantics."""
    if t.ndim == 1:
        t = t[:, None]
    hp = jax.lax.Precision.HIGHEST
    inputs = jnp.concatenate([t, jnp.ones_like(t) * theta], axis=1)

    def act(z):
        return jnp.sin(delta1 * z) * jax.nn.sigmoid(delta2 * z)

    h = act(jnp.dot(inputs, params["w1"], precision=hp) + params["b1"])
    for _ in range(hidn - 1):
        h = act(jnp.dot(h, params["wh"], precision=hp) + params["bh"])
    r = jnp.dot(h, params["wo"], precision=hp) + params["bo"]
    return [r[:, i].reshape(-1, 1) for i in range(r.shape[1])]


if __name__ == "__main__":
    # Small shapes consistent with the pendulum HDNN:
    #   N=256 time samples, inpn=2 (t and m*ones), D_hid=32, hidn=3, outn=2.
    N, D_HID, HIDN, OUTN = 256, 32, 3, 2
    DELTA1, DELTA2 = 1.5, 0.7

    key = jax.random.PRNGKey(0)
    k = jax.random.split(key, 7)
    t = jax.random.uniform(k[0], (N, 1), dtype=jnp.float32,
                           minval=0.0, maxval=4.0)
    theta = jnp.float32(1.3)    # the pendulum mass "m" (scalar)

    scale = 0.5
    params = {
        "w1": scale * jax.random.normal(k[1], (2, D_HID), jnp.float32),
        "b1": scale * jax.random.normal(k[2], (D_HID,), jnp.float32),
        "wh": scale * jax.random.normal(k[3], (D_HID, D_HID), jnp.float32),
        "bh": scale * jax.random.normal(k[4], (D_HID,), jnp.float32),
        "wo": scale * jax.random.normal(k[5], (D_HID, OUTN), jnp.float32),
        "bo": scale * jax.random.normal(k[6], (OUTN,), jnp.float32),
    }

    outs = hdnn_forward(t, theta, params,
                        hidn=HIDN, delta1=DELTA1, delta2=DELTA2)
    outs = jax.block_until_ready(outs)

    refs = hdnn_reference(t, theta, params,
                          hidn=HIDN, delta1=DELTA1, delta2=DELTA2)

    assert len(outs) == OUTN
    for o, r in zip(outs, refs):
        assert o.shape == (N, 1) and o.dtype == t.dtype
        err = float(jnp.max(jnp.abs(o - r)))
        assert jnp.allclose(o, r, atol=1e-3, rtol=1e-3), f"max abs err {err}"

    print("KERNEL_OK")
</pallas_src>

<mosaic_0001>
module attributes {stable_mosaic.version = 11 : i64} {
  func.func @_hdnn_kernel(%arg0: i32, %arg1: memref<16x8xf32, #tpu.memory_space<vmem>>, %arg2: memref<8x256xf32, #tpu.memory_space<vmem>>, %arg3: memref<1x256xf32, #tpu.memory_space<vmem>>, %arg4: memref<256x256xf32, #tpu.memory_space<vmem>>, %arg5: memref<1x256xf32, #tpu.memory_space<vmem>>, %arg6: memref<256x16xf32, #tpu.memory_space<vmem>>, %arg7: memref<1x16xf32, #tpu.memory_space<vmem>>, %arg8: memref<16x16xf32, #tpu.memory_space<vmem>>) attributes {dimension_semantics = [#tpu.dimension_semantics<parallel>], iteration_bounds = array<i64: 2>, scalar_prefetch = 0 : i64, scratch_operands = 0 : i64, tpu.core_type = #tpu.core_type<tc>, window_params = [{transform_indices = @transform_0, window_bounds = array<i64: 16, 8>}, {pipeline_mode = #tpu.pipeline_mode<synchronous>, transform_indices = @transform_1, window_bounds = array<i64: 8, 256>}, {pipeline_mode = #tpu.pipeline_mode<synchronous>, transform_indices = @transform_2, window_bounds = array<i64: 1, 256>}, {pipeline_mode = #tpu.pipeline_mode<synchronous>, transform_indices = @transform_3, window_bounds = array<i64: 256, 256>}, {pipeline_mode = #tpu.pipeline_mode<synchronous>, transform_indices = @transform_4, window_bounds = array<i64: 1, 256>}, {pipeline_mode = #tpu.pipeline_mode<synchronous>, transform_indices = @transform_5, window_bounds = array<i64: 256, 16>}, {pipeline_mode = #tpu.pipeline_mode<synchronous>, transform_indices = @transform_6, window_bounds = array<i64: 1, 16>}, {transform_indices = @transform_7, window_bounds = array<i64: 16, 16>}]} {
    %c0 = arith.constant 0 : index
    %c0_0 = arith.constant 0 : index
    %0 = vector.load %arg1[%c0, %c0_0] : memref<16x8xf32, #tpu.memory_space<vmem>>, vector<16x8xf32>
    %c0_1 = arith.constant 0 : index
    %c0_2 = arith.constant 0 : index
    %1 = vector.load %arg2[%c0_1, %c0_2] : memref<8x256xf32, #tpu.memory_space<vmem>>, vector<8x256xf32>
    %cst = arith.constant dense<0.000000e+00> : vector<16x256xf32>
    %2 = tpu.matmul %0, %1, %cst {dimension_numbers = #tpu.dot_dimension_numbers<[1], [0], [0], [1], [0, 0, 1, 1], [], []>} : vector<16x8xf32>, vector<8x256xf32>, vector<16x256xf32> -> vector<16x256xf32>
    %c0_3 = arith.constant 0 : index
    %c0_4 = arith.constant 0 : index
    %3 = vector.load %arg3[%c0_3, %c0_4] : memref<1x256xf32, #tpu.memory_space<vmem>>, vector<1x256xf32>
    %4 = vector.broadcast %3 : vector<1x256xf32> to vector<16x256xf32>
    %5 = arith.addf %2, %4 : vector<16x256xf32>
    %cst_5 = arith.constant 1.500000e+00 : f32
    %6 = vector.broadcast %cst_5 : f32 to vector<16x256xf32>
    %7 = arith.mulf %6, %5 : vector<16x256xf32>
    %8 = math.sin %7 : vector<16x256xf32>
    %cst_6 = arith.constant 3.500000e-01 : f32
    %9 = vector.broadcast %cst_6 : f32 to vector<16x256xf32>
    %10 = arith.mulf %9, %5 : vector<16x256xf32>
    %11 = math.tanh %10 : vector<16x256xf32>
    %cst_7 = arith.constant 1.000000e+00 : f32
    %12 = vector.broadcast %cst_7 : f32 to vector<16x256xf32>
    %13 = arith.addf %11, %12 : vector<16x256xf32>
    %cst_8 = arith.constant 5.000000e-01 : f32
    %14 = vector.broadcast %cst_8 : f32 to vector<16x256xf32>
    %15 = arith.mulf %14, %13 : vector<16x256xf32>
    %16 = arith.mulf %8, %15 : vector<16x256xf32>
    %c0_9 = arith.constant 0 : index
    %c0_10 = arith.constant 0 : index
    %17 = vector.load %arg4[%c0_9, %c0_10] : memref<256x256xf32, #tpu.memory_space<vmem>>, vector<256x256xf32>
    %c0_11 = arith.constant 0 : index
    %c0_12 = arith.constant 0 : index
    %18 = vector.load %arg5[%c0_11, %c0_12] : memref<1x256xf32, #tpu.memory_space<vmem>>, vector<1x256xf32>
    %cst_13 = arith.constant dense<0.000000e+00> : vector<16x256xf32>
    %19 = tpu.matmul %16, %17, %cst_13 {dimension_numbers = #tpu.dot_dimension_numbers<[1], [0], [0], [1], [0, 0, 1, 1], [], []>} : vector<16x256xf32>, vector<256x256xf32>, vector<16x256xf32> -> vector<16x256xf32>
    %20 = vector.broadcast %18 : vector<1x256xf32> to vector<16x256xf32>
    %21 = arith.addf %19, %20 : vector<16x256xf32>
    %cst_14 = arith.constant 1.500000e+00 : f32
    %22 = vector.broadcast %cst_14 : f32 to vector<16x256xf32>
    %23 = arith.mulf %22, %21 : vector<16x256xf32>
    %24 = math.sin %23 : vector<16x256xf32>
    %cst_15 = arith.constant 3.500000e-01 : f32
    %25 = vector.broadcast %cst_15 : f32 to vector<16x256xf32>
    %26 = arith.mulf %25, %21 : vector<16x256xf32>
    %27 = math.tanh %26 : vector<16x256xf32>
    %cst_16 = arith.constant 1.000000e+00 : f32
    %28 = vector.broadcast %cst_16 : f32 to vector<16x256xf32>
    %29 = arith.addf %27, %28 : vector<16x256xf32>
    %cst_17 = arith.constant 5.000000e-01 : f32
    %30 = vector.broadcast %cst_17 : f32 to vector<16x256xf32>
    %31 = arith.mulf %30, %29 : vector<16x256xf32>
    %32 = arith.mulf %24, %31 : vector<16x256xf32>
    %cst_18 = arith.constant dense<0.000000e+00> : vector<16x256xf32>
    %33 = tpu.matmul %32, %17, %cst_18 {dimension_numbers = #tpu.dot_dimension_numbers<[1], [0], [0], [1], [0, 0, 1, 1], [], []>} : vector<16x256xf32>, vector<256x256xf32>, vector<16x256xf32> -> vector<16x256xf32>
    %34 = vector.broadcast %18 : vector<1x256xf32> to vector<16x256xf32>
    %35 = arith.addf %33, %34 : vector<16x256xf32>
    %cst_19 = arith.constant 1.500000e+00 : f32
    %36 = vector.broadcast %cst_19 : f32 to vector<16x256xf32>
    %37 = arith.mulf %36, %35 : vector<16x256xf32>
    %38 = math.sin %37 : vector<16x256xf32>
    %cst_20 = arith.constant 3.500000e-01 : f32
    %39 = vector.broadcast %cst_20 : f32 to vector<16x256xf32>
    %40 = arith.mulf %39, %35 : vector<16x256xf32>
    %41 = math.tanh %40 : vector<16x256xf32>
    %cst_21 = arith.constant 1.000000e+00 : f32
    %42 = vector.broadcast %cst_21 : f32 to vector<16x256xf32>
    %43 = arith.addf %41, %42 : vector<16x256xf32>
    %cst_22 = arith.constant 5.000000e-01 : f32
    %44 = vector.broadcast %cst_22 : f32 to vector<16x256xf32>
    %45 = arith.mulf %44, %43 : vector<16x256xf32>
    %46 = arith.mulf %38, %45 : vector<16x256xf32>
    %c0_23 = arith.constant 0 : index
    %c0_24 = arith.constant 0 : index
    %47 = vector.load %arg6[%c0_23, %c0_24] : memref<256x16xf32, #tpu.memory_space<vmem>>, vector<256x16xf32>
    %cst_25 = arith.constant dense<0.000000e+00> : vector<16x16xf32>
    %48 = tpu.matmul %46, %47, %cst_25 {dimension_numbers = #tpu.dot_dimension_numbers<[1], [0], [0], [1], [0, 0, 1, 1], [], []>} : vector<16x256xf32>, vector<256x16xf32>, vector<16x16xf32> -> vector<16x16xf32>
    %c0_26 = arith.constant 0 : index
    %c0_27 = arith.constant 0 : index
    %49 = vector.load %arg7[%c0_26, %c0_27] : memref<1x16xf32, #tpu.memory_space<vmem>>, vector<1x16xf32>
    %50 = vector.broadcast %49 : vector<1x16xf32> to vector<16x16xf32>
    %51 = arith.addf %48, %50 : vector<16x16xf32>
    %c0_28 = arith.constant 0 : index
    %c0_29 = arith.constant 0 : index
    %52 = vector.load %arg8[%c0_28, %c0_29] : memref<16x16xf32, #tpu.memory_space<vmem>>, vector<16x16xf32>
    tpu.vector_store %arg8[%c0_28, %c0_29], %51 {strides = array<i32>} : memref<16x16xf32, #tpu.memory_space<vmem>>, vector<16x16xf32>,
    return
  }
  func.func @transform_0(%arg0: i32) -> (i32, i32) {
    %c0_i32 = arith.constant 0 : i32
    %c0_i32_0 = arith.constant 0 : i32
    return %arg0, %c0_i32 : i32, i32
  }
  func.func @transform_1(%arg0: i32) -> (i32, i32) {
    %c0_i32 = arith.constant 0 : i32
    %c0_i32_0 = arith.constant 0 : i32
    %c0_i32_1 = arith.constant 0 : i32
    return %c0_i32, %c0_i32_0 : i32, i32
  }
  func.func @transform_2(%arg0: i32) -> (i32, i32) {
    %c0_i32 = arith.constant 0 : i32
    %c0_i32_0 = arith.constant 0 : i32
    %c0_i32_1 = arith.constant 0 : i32
    return %c0_i32, %c0_i32_0 : i32, i32
  }
  func.func @transform_3(%arg0: i32) -> (i32, i32) {
    %c0_i32 = arith.constant 0 : i32
    %c0_i32_0 = arith.constant 0 : i32
    %c0_i32_1 = arith.constant 0 : i32
    return %c0_i32, %c0_i32_0 : i32, i32
  }
  func.func @transform_4(%arg0: i32) -> (i32, i32) {
    %c0_i32 = arith.constant 0 : i32
    %c0_i32_0 = arith.constant 0 : i32
    %c0_i32_1 = arith.constant 0 : i32
    return %c0_i32, %c0_i32_0 : i32, i32
  }
  func.func @transform_5(%arg0: i32) -> (i32, i32) {
    %c0_i32 = arith.constant 0 : i32
    %c0_i32_0 = arith.constant 0 : i32
    %c0_i32_1 = arith.constant 0 : i32
    return %c0_i32, %c0_i32_0 : i32, i32
  }
  func.func @transform_6(%arg0: i32) -> (i32, i32) {
    %c0_i32 = arith.constant 0 : i32
    %c0_i32_0 = arith.constant 0 : i32
    %c0_i32_1 = arith.constant 0 : i32
    return %c0_i32, %c0_i32_0 : i32, i32
  }
  func.func @transform_7(%arg0: i32) -> (i32, i32) {
    %c0_i32 = arith.constant 0 : i32
    %c0_i32_0 = arith.constant 0 : i32
    return %arg0, %c0_i32 : i32, i32
  }
}

</mosaic_0001>

<bundles_post_ra>
// kernel: tpu_custom_call.1
= control target key start
LH: loop header
LB: loop body
LE: loop exit
PB: predicated region body
PF: predicated region fallthrough
CT: control target
= control target key end

     0   :  { %12 = vsyncpa [#allocation3], 0  ;;  %s2648_s24 = smov 0   ;;  %s3735_s0 = inlined_call_operand.vmem [shape: f32[32,8], index: 0, kind: input, shape index: {}]   ;;  %s3736_s1 = inlined_call_operand.vmem [shape: f32[8,256], index: 1, kind: input, shape index: {}]   ;;  %s3737_s2 = inlined_call_operand.vmem [shape: f32[1,256], index: 2, kind: input, shape index: {}]   ;;  %s3738_s3 = inlined_call_operand.hbm [shape: f32[256,256], index: 3, kind: input, shape index: {}]   ;;  %s3739_s4 = inlined_call_operand.vmem [shape: f32[1,256], index: 4, kind: input, shape index: {}]   ;;  %s3740_s5 = inlined_call_operand.vmem [shape: f32[256,16], index: 5, kind: input, shape index: {}]   ;;  %s3741_s6 = inlined_call_operand.vmem [shape: f32[1,16], index: 6, kind: input, shape index: {}]   ;;  %s3742_s7 = inlined_call_operand.vmem [shape: f32[32,16], index: 7, kind: output, shape index: {}]  }
   0x1 LB: > { %s2132_s25 = sadd.s32 4294967295, %s2596_s24   ;;  %p2134_p0 = scmp.ge.s32.totalorder %s2596_s24, 1  ;;  %s2596_s24 = sphi %s2648_s24, %s18_s24  }
   0x2   : > { %p201_p1 = scmp.lt.s32.totalorder %s2596_s24, 3  ;;  %s2598_s26 = smov [#allocation2]  }
   0x3   : > { %s219_s27 = sshll.u32 %s2598_s26, 4  ;;  %p2662_p3 = scmp.eq.s32.totalorder %s2132_s25, 0  ;;  %s220_s27 = int_to_ptr.vmem [resolvable:$true] %s219_s27 }
   0x4   : > { %p2656_p2 = pnand %p2134_p0, %p201_p1  ;;  %s2558_s10 = scalar_lea.hbm %s3738_s3, 8192 }
   0x5   : > { %s3747_s29 = scalar_select %p2662_p3, 1, 0 }
   0x6   : > { %s3746_s28 = scalar_select %p2656_p2, 1, 0 }
   0x7   : > { %p2462_p4 = pneg %p2656_p2  ;;  %p2559_p6 = scmp.ne.s32.totalorder %s3738_s3, %s2558_s10 }
   0x8   : > { %p2565_p10 = scmp.lt.u32.totalorder %s2558_s10, %s3738_s3 }
   0x9   : > { %p2670_p5 = pnand %p2662_p3, %p2462_p4 }
   0xb   : > { %p2560_p7 = pneg %p2670_p5 }
   0xd   : > { %p2561_p8 = pnand %p2560_p7, %p2559_p6 }
   0xf   : > { %p2562_p9 = pneg %p2561_p8 }
  0x11   : > { %p2567_p11 = pnand %p2565_p10, %p2562_p9 }
  0x13   : > { %2570 = shalt.err (!%p2567_p11)
}
  0x14   : > { %s2571_s15 = scalar_lea.vmem %s220_s27, 8192  ;;  %p2579_p1 = scmp.lt.s32.totalorder %s220_s27, %s220_s27 }
  0x15   : > { %p2572_p12 = scmp.ne.s32.totalorder %s220_s27, %s2571_s15  ;;  %p2580_p4 = scmp.lt.s32.totalorder %s2571_s15, %s2571_s15 }
  0x17   : > { %p2574_p13 = pnand %p2572_p12, %p2560_p7  ;;  %p2581_p3 = por %p2580_p4, %p2579_p1 }
  0x19   : > { %p2575_p0 = pneg %p2574_p13 }
  0x1b   : > { %p2582_p2 = pnand %p2581_p3, %p2575_p0 }
  0x1d   : > { %2585 = shalt.err (!%p2582_p2)
}
  0x1e   : > { %s2599_s16 = smov 256   ;;  %s2600_s17 = smov 16  }
  0x1f   : > { %2465 = dma.hbm_to_vmem [thread:$0]  (!%p2670_p5), %s3738_s3, 8192, %s220_s27, [#allocation3], %s2599_s16, %s2599_s16, %s2600_s17  }
  0x20   : > { %p3749_p6 = scmp.ne.s32.totalorder %s3746_s28, 0 }
  0x21   : > { %p3750_p8 = scmp.ne.s32.totalorder (!%p3749_p6), %s3747_s29, 0 }
  0x22   : > { %253 = sbr.rel (%p3749_p6) target bundleno = 1284 (0x504), region = 48 }
  0x29   : > { %2591 = dma.done.wait (%p3750_p8), [#allocation3], 8192  }
  0x2a   : > { %2593 = vsyncadd (%p3750_p8), [#allocation3], 4294959104  ;;  %s2139_s20 = sshll.u32 %s2132_s25, 1  ;;  %v2601_v0 = vmov 0.0   ;;  %v300_v1 = vld [vmem:[%s3736_s1 + $0x8] sm:$0xff]  ;;  %v299_v2 = vld [vmem:[%s3736_s1] sm:$0xff] }
  0x2b   : > { %384 = vmatprep.mubr.f32.mxu0 %v2601_v0  ;;  %p286_p2 = scmp.lt.s32.totalorder %s2139_s20, 3  ;;  %vm313_vm0 = vcmask 64512   ;;  %320 = vmatprep.subr.mxu0 %v300_v1  ;;  %v838_v5 = vld [vmem:[#allocation2 + $0x8] sm:$0xff]  ;;  %v840_v6 = vld [vmem:[#allocation2 + $0x18] sm:$0xff]  ;;  %v837_v8 = vld [vmem:[#allocation2] sm:$0xff] }
  0x2c   : > { %321 = vmatpush1.msra.mxu0 %v299_v2  ;;  %v2234_v7 = vpack.c.bf16 %v840_v6, %v838_v5  ;;  %v839_v9 = vld [vmem:[#allocation2 + $0x10] sm:$0xff]  ;;  %v842_v11 = vld [vmem:[#allocation2 + $0x28] sm:$0xff]  ;;  %v844_v12 = vld [vmem:[#allocation2 + $0x38] sm:$0xff] }
  0x2d   : > { %s3772_s20 = smov (!%p286_p2, %s2139_s20), 3  ;;  %v2236_v10 = vpack.c.bf16 %v839_v9, %v837_v8  ;;  %v2238_v13 = vpack.c.bf16 %v844_v12, %v842_v11  ;;  %v841_v14 = vld [vmem:[#allocation2 + $0x20] sm:$0xff]  ;;  %v843_v15 = vld [vmem:[#allocation2 + $0x30] sm:$0xff]  ;;  %v846_v17 = vld [vmem:[#allocation2 + $0x48] sm:$0xff] }
  0x2e   : > { %s2140_s21 = sshll.u32 %s3772_s20, 3  ;;  %2235 = vmatprep.subr.bf16.mxu1 %v2234_v7  ;;  %2299 = vmatprep.subr.bf16.mxu0 %v2234_v7  ;;  %v2240_v16 = vpack.c.bf16 %v843_v15, %v841_v14  ;;  %v848_v18 = vld [vmem:[#allocation2 + $0x58] sm:$0xff]  ;;  %v845_v20 = vld [vmem:[#allocation2 + $0x40] sm:$0xff]  ;;  %v847_v21 = vld [vmem:[#allocation2 + $0x50] sm:$0xff] }
  0x2f   : > { %s289_s26 = scalar_lea.vmem %s3735_s0, %s2140_s21  ;;  %2237 = vmatpush1.bf16.msra.mxu1 %v2236_v10  ;;  %v2242_v19 = vpack.c.bf16 %v848_v18, %v846_v17  ;;  %v2244_v22 = vpack.c.bf16 %v847_v21, %v845_v20  ;;  %v850_v23 = vld [vmem:[#allocation2 + $0x68] sm:$0xff]  ;;  %v852_v24 = vld [vmem:[#allocation2 + $0x78] sm:$0xff]  ;;  %v849_v26 = vld [vmem:[#allocation2 + $0x60] sm:$0xff]  ;;  %s295_s19 = scalar_lea.vmem %s3742_s7, %s2140_s21 }
  0x30   : > { %v297_v3 = vld [vmem:[%s289_s26] sm:$0xff]  ;;  %v298_v4 = vld [vmem:[%s289_s26 + $0x8] sm:$0xff]  ;;  %2239 = vmatprep.subr.bf16.mxu1 %v2238_v13  ;;  %v2246_v25 = vpack.c.bf16 %v852_v24, %v850_v23  ;;  %v851_v27 = vld [vmem:[#allocation2 + $0x70] sm:$0xff] }
  0x31   : > { %2143 = vmatmul.mubr.msk.f32.vlgmr.msra.gmra.mrb[0].mxu0 %vm313_vm0, %v297_v3  ;;  %v2248_v28 = vpack.c.bf16 %v851_v27, %v849_v26  ;;  %v854_v29 = vld [vmem:[#allocation2 + $0x88] sm:$0xff]  ;;  %v856_v30 = vld [vmem:[#allocation2 + $0x98] sm:$0xff]  ;;  %v853_v32 = vld [vmem:[#allocation2 + $0x80] sm:$0xff] }
  0x32   : > { %390 = vmatprep.mubr.f32.mxu0 %v2601_v0  ;;  %2301 = vmatpush1.bf16.msra.mxu0 %v2236_v10  ;;  %v2250_v31 = vpack.c.bf16 %v856_v30, %v854_v29  ;;  %v855_v33 = vld [vmem:[#allocation2 + $0x90] sm:$0xff]  ;;  %v858_v35 = vld [vmem:[#allocation2 + $0xa8] sm:$0xff]  ;;  %v860_v36 = vld [vmem:[#allocation2 + $0xb8] sm:$0xff] }
  0x33   : > { %2303 = vmatprep.subr.bf16.mxu0 %v2238_v13  ;;  %2241 = vmatpush1.bf16.msra.mxu1 %v2240_v16  ;;  %v2252_v34 = vpack.c.bf16 %v855_v33, %v853_v32  ;;  %v2254_v37 = vpack.c.bf16 %v860_v36, %v858_v35  ;;  %v857_v38 = vld [vmem:[#allocation2 + $0xa0] sm:$0xff]  ;;  %v859_v39 = vld [vmem:[#allocation2 + $0xb0] sm:$0xff]  ;;  %v862_v41 = vld [vmem:[#allocation2 + $0xc8] sm:$0xff]  ;;  %v303_v36 = vlaneseq }
  0x34   : > { %2243 = vmatprep.subr.bf16.mxu1 %v2242_v19  ;;  %v2256_v40 = vpack.c.bf16 %v859_v39, %v857_v38  ;;  %v864_v42 = vld [vmem:[#allocation2 + $0xd8] sm:$0xff]  ;;  %v861_v44 = vld [vmem:[#allocation2 + $0xc0] sm:$0xff]  ;;  %v863_v45 = vld [vmem:[#allocation2 + $0xd0] sm:$0xff] }
  0x35   : > { %2144 = vmatmul.mubr.msk.f32.gmra.mrb[2].mxu0 %vm313_vm0, %v298_v4  ;;  %v2258_v43 = vpack.c.bf16 %v864_v42, %v862_v41  ;;  %v2260_v46 = vpack.c.bf16 %v863_v45, %v861_v44  ;;  %v866_v47 = vld [vmem:[#allocation2 + $0xe8] sm:$0xff]  ;;  %v868_v48 = vld [vmem:[#allocation2 + $0xf8] sm:$0xff]  ;;  %v865_v50 = vld [vmem:[#allocation2 + $0xe0] sm:$0xff]  ;;  %v2712_v38 = vshrl.u32 %v303_v36, 7 }
  0x36   : > { %2305 = vmatpush1.bf16.msra.mxu0 %v2240_v16  ;;  %v2262_v49 = vpack.c.bf16 %v868_v48, %v866_v47  ;;  %v867_v51 = vld [vmem:[#allocation2 + $0xf0] sm:$0xff]  ;;  %v870_v53 = vld [vmem:[#allocation2 + $0x108] sm:$0xff]  ;;  %v872_v54 = vld [vmem:[#allocation2 + $0x118] sm:$0xff] }
  0x37   : > { %2307 = vmatprep.subr.bf16.mxu0 %v2242_v19  ;;  %2245 = vmatpush1.bf16.msra.mxu1 %v2244_v22  ;;  %v2264_v52 = vpack.c.bf16 %v867_v51, %v865_v50  ;;  %v2266_v55 = vpack.c.bf16 %v872_v54, %v870_v53  ;;  %v869_v56 = vld [vmem:[#allocation2 + $0x100] sm:$0xff]  ;;  %v871_v57 = vld [vmem:[#allocation2 + $0x110] sm:$0xff]  ;;  %v874_v59 = vld [vmem:[#allocation2 + $0x128] sm:$0xff]  ;;  %v305_v39 = vsub.s32 0, %v2712_v38  ;;  %v309_v41 = vsub.s32 1, %v2712_v38 }
  0x38   : > { %2247 = vmatprep.subr.bf16.mxu1 %v2246_v25  ;;  %v2268_v58 = vpack.c.bf16 %v871_v57, %v869_v56  ;;  %v876_v60 = vld [vmem:[#allocation2 + $0x138] sm:$0xff]  ;;  %v873_v62 = vld [vmem:[#allocation2 + $0x120] sm:$0xff]  ;;  %v875_v63 = vld [vmem:[#allocation2 + $0x130] sm:$0xff] }
  0x39   : > { %v2270_v61 = vpack.c.bf16 %v876_v60, %v874_v59  ;;  %v2272_v0 = vpack.c.bf16 %v875_v63, %v873_v62  ;;  %v878_v1 = vld [vmem:[#allocation2 + $0x148] sm:$0xff]  ;;  %v880_v2 = vld [vmem:[#allocation2 + $0x158] sm:$0xff]  ;;  %v877_v4 = vld [vmem:[#allocation2 + $0x140] sm:$0xff] }
  0x3a   : > { %2309 = vmatpush1.bf16.msra.mxu0 %v2244_v22  ;;  %v2274_v3 = vpack.c.bf16 %v880_v2, %v878_v1  ;;  %v879_v5 = vld [vmem:[#allocation2 + $0x150] sm:$0xff]  ;;  %v882_v7 = vld [vmem:[#allocation2 + $0x168] sm:$0xff]  ;;  %v884_v8 = vld [vmem:[#allocation2 + $0x178] sm:$0xff] }
  0x3b   : > { %2311 = vmatprep.subr.bf16.mxu0 %v2246_v25  ;;  %2249 = vmatpush1.bf16.msra.mxu1 %v2248_v28  ;;  %v2276_v6 = vpack.c.bf16 %v879_v5, %v877_v4  ;;  %v2278_v9 = vpack.c.bf16 %v884_v8, %v882_v7  ;;  %v881_v10 = vld [vmem:[#allocation2 + $0x160] sm:$0xff]  ;;  %v883_v11 = vld [vmem:[#allocation2 + $0x170] sm:$0xff]  ;;  %v886_v13 = vld [vmem:[#allocation2 + $0x188] sm:$0xff] }
  0x3c   : > { %2251 = vmatprep.subr.bf16.mxu1 %v2250_v31  ;;  %v2280_v12 = vpack.c.bf16 %v883_v11, %v881_v10  ;;  %v888_v14 = vld [vmem:[#allocation2 + $0x198] sm:$0xff]  ;;  %v885_v15 = vld [vmem:[#allocation2 + $0x180] sm:$0xff]  ;;  %v887_v17 = vld [vmem:[#allocation2 + $0x190] sm:$0xff] }
  0x3d   : > { %v2282_v16 = vpack.c.bf16 %v888_v14, %v886_v13  ;;  %v890_v18 = vld [vmem:[#allocation2 + $0x1a8] sm:$0xff]  ;;  %v892_v19 = vld [vmem:[#allocation2 + $0x1b8] sm:$0xff]  ;;  %v2284_v20 = vpack.c.bf16 %v887_v17, %v885_v15  ;;  %v889_v22 = vld [vmem:[#allocation2 + $0x1a0] sm:$0xff]  ;;  %v2602_v15 = vmov 683565275  }
  0x3e   : > { %2313 = vmatpush1.bf16.msra.mxu0 %v2248_v28  ;;  %v2286_v21 = vpack.c.bf16 %v892_v19, %v890_v18  ;;  %v891_v23 = vld [vmem:[#allocation2 + $0x1b0] sm:$0xff]  ;;  %v894_v24 = vld [vmem:[#allocation2 + $0x1c8] sm:$0xff]  ;;  %v896_v25 = vld [vmem:[#allocation2 + $0x1d8] sm:$0xff]  ;;  %v2603_v17 = vmov 2475754826  }
  0x3f   : > { %2315 = vmatprep.subr.bf16.mxu0 %v2250_v31  ;;  %2253 = vmatpush1.bf16.msra.mxu1 %v2252_v34  ;;  %v2288_v26 = vpack.c.bf16 %v891_v23, %v889_v22  ;;  %v2290_v27 = vpack.c.bf16 %v896_v25, %v894_v24  ;;  %v893_v28 = vld [vmem:[#allocation2 + $0x1c0] sm:$0xff]  ;;  %v895_v29 = vld [vmem:[#allocation2 + $0x1d0] sm:$0xff]  ;;  %v898_v30 = vld [vmem:[#allocation2 + $0x1e8] sm:$0xff]  ;;  %v2604_v19 = vmov 2131351028  }
  0x40   : > { %2255 = vmatprep.subr.bf16.mxu1 %v2254_v37  ;;  %v900_v31 = vld [vmem:[#allocation2 + $0x1f8] sm:$0xff]  ;;  %v2292_v32 = vpack.c.bf16 %v895_v29, %v893_v28  ;;  %v899_v35 = vld [vmem:[#allocation2 + $0x1f0] sm:$0xff] }
  0x41   : > { %v2294_v33 = vpack.c.bf16 %v900_v31, %v898_v30  ;;  %v2607_v30 = vmov 1326507024  }
  0x42   : > { %2317 = vmatpush1.bf16.msra.mxu0 %v2252_v34  ;;  %v897_v34 = vld [vmem:[#allocation2 + $0x1e0] sm:$0xff] }
  0x43   : > { %2319 = vmatprep.subr.bf16.mxu0 %v2254_v37  ;;  %2257 = vmatpush1.bf16.msra.mxu1 %v2256_v40  ;;  %v2296_v37 = vpack.c.bf16 %v899_v35, %v897_v34 }
  0x44   : > { %2259 = vmatprep.subr.bf16.mxu1 %v2258_v43 }
  0x46   : > { %2321 = vmatpush1.bf16.msra.mxu0 %v2256_v40  ;;  %v301_v40 = vld [vmem:[%s3737_s2] sm:$0x3] }
  0x47   : > { %2323 = vmatprep.subr.bf16.mxu0 %v2258_v43  ;;  %2261 = vmatpush1.bf16.msra.mxu1 %v2260_v46  ;;  %v306_v42 = vrot.slane %v301_v40, %v305_v39  ;;  %v310_v43 = vrot.slane %v301_v40, %v309_v41 }
  0x48   : > { %2263 = vmatprep.subr.bf16.mxu1 %v2262_v49 }
  0x4a   : > { %2325 = vmatpush1.bf16.msra.mxu0 %v2260_v46 }
  0x4b   : > { %2327 = vmatprep.subr.bf16.mxu0 %v2262_v49  ;;  %2265 = vmatpush1.bf16.msra.mxu1 %v2264_v52 }
  0x4c   : > { %2267 = vmatprep.subr.bf16.mxu1 %v2266_v55 }
  0x4e   : > { %2329 = vmatpush1.bf16.msra.mxu0 %v2264_v52 }
  0x4f   : > { %2331 = vmatprep.subr.bf16.mxu0 %v2266_v55  ;;  %2269 = vmatpush1.bf16.msra.mxu1 %v2268_v58 }
  0x50   : > { %2271 = vmatprep.subr.bf16.mxu1 %v2270_v61 }
  0x52   : > { %2333 = vmatpush1.bf16.msra.mxu0 %v2268_v58 }
  0x53   : > { %2335 = vmatprep.subr.bf16.mxu0 %v2270_v61  ;;  %2273 = vmatpush1.bf16.msra.mxu1 %v2272_v0 }
  0x54   : > { %2275 = vmatprep.subr.bf16.mxu1 %v2274_v3 }
  0x56   : > { %2337 = vmatpush1.bf16.msra.mxu0 %v2272_v0 }
  0x57   : > { %2339 = vmatprep.subr.bf16.mxu0 %v2274_v3  ;;  %2277 = vmatpush1.bf16.msra.mxu1 %v2276_v6 }
  0x58   : > { %2279 = vmatprep.subr.bf16.mxu1 %v2278_v9 }
  0x5a   : > { %2341 = vmatpush1.bf16.msra.mxu0 %v2276_v6 }
  0x5b   : > { %2343 = vmatprep.subr.bf16.mxu0 %v2278_v9  ;;  %2281 = vmatpush1.bf16.msra.mxu1 %v2280_v12 }
  0x5c   : > { %2283 = vmatprep.subr.bf16.mxu1 %v2282_v16 }
  0x5e   : > { %2345 = vmatpush1.bf16.msra.mxu0 %v2280_v12 }
  0x5f   : > { %2347 = vmatprep.subr.bf16.mxu0 %v2282_v16  ;;  %2285 = vmatpush1.bf16.msra.mxu1 %v2284_v20 }
  0x60   : > { %2287 = vmatprep.subr.bf16.mxu1 %v2286_v21 }
  0x62   : > { %2349 = vmatpush1.bf16.msra.mxu0 %v2284_v20 }
  0x63   : > { %2351 = vmatprep.subr.bf16.mxu0 %v2286_v21  ;;  %2289 = vmatpush1.bf16.msra.mxu1 %v2288_v26  ;;  %v2605_v21 = vmov 2102212464  }
  0x64   : > { %2291 = vmatprep.subr.bf16.mxu1 %v2290_v27 }
  0x66   : > { %2353 = vmatpush1.bf16.msra.mxu0 %v2288_v26  ;;  %v2606_v26 = vmov 920167782  }
  0x67   : > { %2355 = vmatprep.subr.bf16.mxu0 %v2290_v27  ;;  %2293 = vmatpush1.bf16.msra.mxu1 %v2292_v32 }
  0x68   : > { %2295 = vmatprep.subr.bf16.mxu1 %v2294_v33 }
  0x6a   : > { %2357 = vmatpush1.bf16.msra.mxu0 %v2292_v32 }
  0x6b   : > { %2359 = vmatprep.subr.bf16.mxu0 %v2294_v33  ;;  %2297 = vmatpush1.bf16.msra.mxu1 %v2296_v37 }
  0x6e   : > { %2361 = vmatpush1.bf16.msra.mxu0 %v2296_v37 }
 0x104   : > { %v386_v44 = vpop.f32.mrb[0].mxu0 }
 0x105   : > { %v2723_v45 = vadd.f32 %v386_v44, %v306_v42  ;;  %v388_v46 = vpop.f32.mrb[1].mxu0 }
 0x106   : > { %v2725_v47 = vadd.f32 %v388_v46, %v310_v43 }
 0x107   : > { %v2728_v48 = vmul.f32 1.5, %v2723_v45 }
 0x108   : > { %v2731_v49 = vmul.f32 1.5, %v2725_v47  ;;  %v392_v50 = vpop.f32.mrb[2].mxu0 }
 0x109   : > { %v401_v51 = vand.u32 2147483647, %v2728_v48  ;;  %v404_v52 = vand.u32 2139095040, %v2728_v48  ;;  %v394_v53 = vpop.f32.mrb[3].mxu0  ;;  %v2735_v54 = vadd.f32 %v392_v50, %v306_v42 }
 0x10a   : > { %v508_v57 = vand.u32 2139095040, %v2731_v49  ;;  %v2743_v60 = vadd.f32 %v394_v53, %v310_v43 }
 0x10b   : > { %v405_v55 = vshrl.u32 %v404_v52, 23  ;;  %v408_v56 = vand.u32 8388607, %v401_v51  ;;  %v2741_v58 = vmul.f32 1.5, %v2735_v54 }
 0x10c   : > { %v509_v1 = vshrl.u32 %v508_v57, 23  ;;  %v2750_v4 = vmul.f32 1.5, %v2743_v60 }
 0x10d   : > { %v2145_v59 = vadd.s32 4294967169, %v405_v55  ;;  %v609_v61 = vand.u32 2147483647, %v2741_v58  ;;  %v612_v62 = vand.u32 2139095040, %v2741_v58  ;;  %v409_v0 = vor.u32 8388608, %v408_v56 }
 0x10e   : > { %v2149_v10 = vadd.s32 4294967169, %v509_v1  ;;  %v716_v14 = vand.u32 2139095040, %v2750_v4 }
 0x10f   : > { %v411_v63 = vadd.s32 1, %v2145_v59  ;;  %v613_v2 = vshrl.u32 %v612_v62, 23  ;;  %v616_v3 = vand.u32 8388607, %v609_v61  ;;  %v2752_v9 = vshll.u32 %v409_v0, 8 }
 0x110   : > { %v2766_v56 = vadd.s32 1, %v2149_v10 }
 0x111   : > { %vm412_vm1 = vcmp.gt.s32.totalorder %v411_v63, 0  ;;  %v2153_v6 = vadd.s32 4294967169, %v613_v2  ;;  %v617_v12 = vor.u32 8388608, %v616_v3 }
 0x112   : > { %v413_v5 = vsel %vm412_vm1, %v411_v63, 0  ;;  %vm516_vm12 = vcmp.gt.s32.totalorder %v2766_v56, 0 }
 0x113   : > { %v415_v7 = vand.u32 31, %v413_v5  ;;  %v414_v8 = vshrl.u32 %v413_v5, 5  ;;  %v619_v13 = vadd.s32 1, %v2153_v6 }
 0x115   : > { %v416_v11 = vsub.s32 32, %v415_v7  ;;  %v418_v16 = vshll.u32 %v2602_v15, %v415_v7  ;;  %v421_v18 = vshll.u32 %v2603_v17, %v415_v7  ;;  %v424_v20 = vshll.u32 %v2604_v19, %v415_v7 }
 0x116   : > { %v427_v22 = vshll.u32 %v2605_v21, %v415_v7  ;;  %v430_v27 = vshll.u32 %v2606_v26, %v415_v7  ;;  %vm433_vm2 = vcmp.lt.s32.totalorder %v414_v8, 1  ;;  %vm435_vm3 = vcmp.lt.s32.totalorder %v414_v8, 3 }
 0x117   : > { %v419_v23 = vshrl.u32 %v2603_v17, %v416_v11  ;;  %v422_v24 = vshrl.u32 %v2604_v19, %v416_v11  ;;  %v425_v25 = vshrl.u32 %v2605_v21, %v416_v11  ;;  %v417_v28 = vshrl.u32 %v2602_v15, %v416_v11 }
 0x118   : > { %v428_v29 = vshrl.u32 %v2606_v26, %v416_v11  ;;  %v431_v31 = vshrl.u32 %v2607_v30, %v416_v11  ;;  %vm436_vm4 = vcmp.lt.s32.totalorder %v414_v8, 4  ;;  %vm620_vm5 = vcmp.gt.s32.totalorder %v619_v13, 0 }
 0x119   : > { %v420_v32 = vor.u32 %v419_v23, %v418_v16  ;;  %v423_v33 = vor.u32 %v422_v24, %v421_v18  ;;  %v426_v34 = vor.u32 %v425_v25, %v424_v20  ;;  %v621_v52 = vsel %vm620_vm5, %v619_v13, 0 }
 0x11a   : > { %v429_v35 = vor.u32 %v428_v29, %v427_v22  ;;  %v432_v36 = vor.u32 %v431_v31, %v430_v27  ;;  %vm434_vm6 = vcmp.lt.s32.totalorder %v414_v8, 2  ;;  %v623_v63 = vand.u32 31, %v621_v52 }
 0x11b   : > { %v437_v37 = vsel %vm433_vm2, %v417_v28, %v420_v32  ;;  %v438_v40 = vsel %vm436_vm4, %v426_v34, 2102212464  ;;  %v441_v42 = vsel %vm433_vm2, %v420_v32, %v423_v33  ;;  %v445_v43 = vsel %vm433_vm2, %v423_v33, %v426_v34 }
 0x11c   : > { %v439_v44 = vsel %vm435_vm3, %v423_v33, %v438_v40  ;;  %v442_v46 = vsel %vm436_vm4, %v429_v35, 920167782  ;;  %v446_v50 = vsel %vm436_vm4, %v432_v36, 1326507024  ;;  %v622_v5 = vshrl.u32 %v621_v52, 5 }
 0x11d   : > { %v443_v53 = vsel %vm435_vm3, %v426_v34, %v442_v46  ;;  %v447_v55 = vsel %vm435_vm3, %v429_v35, %v446_v50  ;;  %v440_v57 = vsel %vm434_vm6, %v437_v37, %v439_v44  ;;  %v624_v6 = vsub.s32 32, %v623_v63 }
 0x11e   : > { %v444_v59 = vsel %vm434_vm6, %v441_v42, %v443_v53  ;;  %v448_v62 = vsel %vm434_vm6, %v445_v43, %v447_v55  ;;  %v657_v7 = vshll.u32 %v617_v12, 8  ;;  %v717_v8 = vshrl.u32 %v716_v14, 23 }
 0x11f   : > { %v2769_v0 = vmul.u32.u64.low %v2752_v9, %v448_v62  ;;  %v2770_v1 = vmul.u32.u64.high %v2752_v9, %v448_v62, %v2769_v0  ;;  %v2773_v2 = vmul.u32.u64.low %v2752_v9, %v444_v59  ;;  %v2774_v3 = vmul.u32.u64.high %v2752_v9, %v444_v59, %v2773_v2 }
 0x120   : > { %v456_v10 = vmul.u32 %v2752_v9, %v440_v57  ;;  %v626_v11 = vshll.u32 %v2602_v15, %v623_v63  ;;  %v629_v13 = vshll.u32 %v2603_v17, %v623_v63  ;;  %v632_v16 = vshll.u32 %v2604_v19, %v623_v63 }
 0x121   : > { %v627_v18 = vshrl.u32 %v2603_v17, %v624_v6  ;;  %v630_v20 = vshrl.u32 %v2604_v19, %v624_v6  ;;  %v633_v22 = vshrl.u32 %v2605_v21, %v624_v6  ;;  %v635_v23 = vshll.u32 %v2605_v21, %v623_v63 }
 0x122   : > { %vm458_vm7 = vc.u32 %v2770_v1, %v2773_v2  ;;  %v459_v12 = vadd.s32 1, %v2774_v3  ;;  %v636_v9 = vshrl.u32 %v2606_v26, %v624_v6  ;;  %v638_v14 = vshll.u32 %v2606_v26, %v623_v63 }
 0x123   : > { %v628_v24 = vor.u32 %v627_v18, %v626_v11  ;;  %v631_v25 = vor.u32 %v630_v20, %v629_v13  ;;  %v634_v27 = vor.u32 %v633_v22, %v632_v16  ;;  %v639_v28 = vshrl.u32 %v2607_v30, %v624_v6 }
 0x124   : > { %v460_v29 = vsel %vm458_vm7, %v459_v12, %v2774_v3  ;;  %v637_v31 = vor.u32 %v636_v9, %v635_v23  ;;  %vm641_vm8 = vcmp.lt.s32.totalorder %v622_v5, 1  ;;  %vm644_vm9 = vcmp.lt.s32.totalorder %v622_v5, 4 }
 0x125   : > { %v461_v32 = vadd.s32 %v460_v29, %v456_v10  ;;  %v625_v33 = vshrl.u32 %v2602_v15, %v624_v6  ;;  %v640_v34 = vor.u32 %v639_v28, %v638_v14  ;;  %v646_v35 = vsel %vm644_vm9, %v634_v27, 2102212464 }
 0x126   : > { %vm643_vm10 = vcmp.lt.s32.totalorder %v622_v5, 3  ;;  %v649_v36 = vsel %vm641_vm8, %v628_v24, %v631_v25  ;;  %v650_v37 = vsel %vm644_vm9, %v637_v31, 920167782  ;;  %v653_v40 = vsel %vm641_vm8, %v631_v25, %v634_v27 }
 0x127   : > { %v462_v42 = vadd.s32 536870912, %v461_v32  ;;  %vm642_vm11 = vcmp.lt.s32.totalorder %v622_v5, 2  ;;  %v651_v43 = vsel %vm643_vm10, %v634_v27, %v650_v37  ;;  %v654_v44 = vsel %vm644_vm9, %v640_v34, 1326507024 }
 0x128   : > { %v645_v46 = vsel %vm641_vm8, %v625_v33, %v628_v24  ;;  %v647_v50 = vsel %vm643_vm10, %v631_v25, %v646_v35  ;;  %v652_v52 = vsel %vm642_vm11, %v649_v36, %v651_v43  ;;  %v655_v53 = vsel %vm643_vm10, %v637_v31, %v654_v44 }
 0x129   : > { %v2793_v55 = vshrl.u32 %v462_v42, 30  ;;  %v656_v57 = vsel %vm642_vm11, %v653_v40, %v655_v53  ;;  %v2795_v59 = vmul.u32.u64.low %v657_v7, %v652_v52  ;;  %v2796_v62 = vmul.u32.u64.high %v657_v7, %v652_v52, %v2795_v59 }
 0x12a   : > { %v2799_v63 = vmul.u32.u64.low %v657_v7, %v656_v57  ;;  %v2800_v0 = vmul.u32.u64.high %v657_v7, %v656_v57, %v2799_v63  ;;  %v713_v3 = vand.u32 2147483647, %v2750_v4  ;;  %v2157_v6 = vadd.s32 4294967169, %v717_v8 }
 0x12b   : > { %v464_v5 = vshll.u32 %v2793_v55, 30  ;;  %v648_v10 = vsel %vm642_vm11, %v645_v46, %v647_v50  ;;  %v667_v13 = vadd.s32 1, %v2796_v62  ;;  %v2813_v8 = vsel %vm516_vm12, %v2766_v56, 0 }
 0x12c   : > { %v723_v11 = vadd.s32 1, %v2157_v6  ;;  %v664_v16 = vmul.u32 %v657_v7, %v648_v10  ;;  %vm666_vm13 = vc.u32 %v2800_v0, %v2795_v59  ;;  %v720_v18 = vand.u32 8388607, %v713_v3 }
 0x12d   : > { %v2810_v20 = vsub.s32 %v461_v32, %v464_v5  ;;  %v668_v22 = vsel %vm666_vm13, %v667_v13, %v2796_v62  ;;  %v2817_v14 = vand.u32 31, %v2813_v8  ;;  %v505_v63 = vand.u32 2147483647, %v2731_v49 }
 0x12e   : > { %vm724_vm14 = vcmp.gt.s32.totalorder %v723_v11, 0  ;;  %v669_v12 = vadd.s32 %v668_v22, %v664_v16  ;;  %v721_v27 = vor.u32 8388608, %v720_v18  ;;  %vm403_vm12 = vcmp.lt.s32.totalorder %v2728_v48, 0 }
 0x12f   : > { %v725_v23 = vsel %vm724_vm14, %v723_v11, 0  ;;  %v467_v25 = vsub.s32 0, %v2810_v20  ;;  %v520_v6 = vsub.s32 32, %v2817_v14  ;;  %vm715_vm14 = vcmp.lt.s32.totalorder %v2750_v4, 0 }
 0x130   : > { %v727_v9 = vand.u32 31, %v725_v23  ;;  %v670_v7 = vadd.s32 536870912, %v669_v12  ;;  %v726_v28 = vshrl.u32 %v725_v23, 5  ;;  %v761_v10 = vshll.u32 %v721_v27, 8 }
 0x131   : > { %v2146_v46 = vmin.u32 %v467_v25, %v2810_v20  ;;  %v512_v25 = vand.u32 8388607, %v505_v63 }
 0x132   : > { %v728_v24 = vsub.s32 32, %v727_v9  ;;  %v730_v29 = vshll.u32 %v2602_v15, %v727_v9  ;;  %v2821_v31 = vshrl.u32 %v670_v7, 30  ;;  %v733_v32 = vshll.u32 %v2603_v17, %v727_v9 }
 0x133   : > { %v739_v35 = vshll.u32 %v2605_v21, %v727_v9  ;;  %v736_v44 = vshll.u32 %v2604_v19, %v727_v9  ;;  %v742_v52 = vshll.u32 %v2606_v26, %v727_v9  ;;  %vm745_vm15 = vcmp.lt.s32.totalorder %v726_v28, 1 }
 0x134   : > { %v731_v56 = vshrl.u32 %v2603_v17, %v728_v24  ;;  %v734_v33 = vshrl.u32 %v2604_v19, %v728_v24  ;;  %v737_v34 = vshrl.u32 %v2605_v21, %v728_v24  ;;  %v740_v36 = vshrl.u32 %v2606_v26, %v728_v24 }
 0x135   : > { %v743_v37 = vshrl.u32 %v2607_v30, %v728_v24  ;;  %v672_v40 = vshll.u32 %v2821_v31, 30  ;;  %vm748_vm0 = vcmp.lt.s32.totalorder %v726_v28, 4  ;;  %v469_v11 = vclz %v2146_v46 }
 0x136   : > { %v732_v42 = vor.u32 %v731_v56, %v730_v29  ;;  %v735_v43 = vor.u32 %v734_v33, %v733_v32  ;;  %v741_v50 = vor.u32 %v740_v36, %v739_v35  ;;  %v738_v57 = vor.u32 %v737_v34, %v736_v44 }
 0x137   : > { %v2834_v53 = vsub.s32 %v669_v12, %v672_v40  ;;  %v744_v62 = vor.u32 %v743_v37, %v742_v52  ;;  %vm746_vm1 = vcmp.lt.s32.totalorder %v726_v28, 2  ;;  %vm747_vm2 = vcmp.lt.s32.totalorder %v726_v28, 3 }
 0x138   : > { %v753_v5 = vsel %vm745_vm15, %v732_v42, %v735_v43  ;;  %v754_v13 = vsel %vm748_vm0, %v741_v50, 920167782  ;;  %v750_v18 = vsel %vm748_vm0, %v738_v57, 2102212464  ;;  %v757_v23 = vsel %vm745_vm15, %v735_v43, %v738_v57 }
 0x139   : > { %v675_v16 = vsub.s32 0, %v2834_v53  ;;  %v755_v22 = vsel %vm747_vm2, %v738_v57, %v754_v13  ;;  %v729_v12 = vshrl.u32 %v2602_v15, %v728_v24  ;;  %v758_v7 = vsel %vm748_vm0, %v744_v62, 1326507024 }
 0x13a   : > { %v756_v9 = vsel %vm746_vm1, %v753_v5, %v755_v22  ;;  %v759_v29 = vsel %vm747_vm2, %v741_v50, %v758_v7  ;;  %v523_v32 = vshrl.u32 %v2603_v17, %v520_v6  ;;  %v751_v34 = vsel %vm747_vm2, %v735_v43, %v750_v18 }
 0x13b   : > { %v2845_v27 = vmul.u32.u64.low %v761_v10, %v756_v9  ;;  %v2846_v56 = vmul.u32.u64.high %v761_v10, %v756_v9, %v2845_v27  ;;  %v749_v33 = vsel %vm745_vm15, %v729_v12, %v732_v42  ;;  %v760_v35 = vsel %vm746_vm1, %v757_v23, %v759_v29 }
 0x13c   : > { %v526_v24 = vshrl.u32 %v2604_v19, %v520_v6  ;;  %v2147_v36 = vadd.s32 4294967294, %v469_v11  ;;  %v2154_v37 = vmin.u32 %v675_v16, %v2834_v53  ;;  %v522_v46 = vshll.u32 %v2602_v15, %v2817_v14 }
 0x13d   : > { %v2854_v40 = vmul.u32.u64.low %v761_v10, %v760_v35  ;;  %v2855_v44 = vmul.u32.u64.high %v761_v10, %v760_v35, %v2854_v40  ;;  %v525_v50 = vshll.u32 %v2603_v17, %v2817_v14  ;;  %v529_v52 = vshrl.u32 %v2605_v21, %v520_v6 }
 0x13e   : > { %v532_v42 = vshrl.u32 %v2606_v26, %v520_v6  ;;  %v752_v43 = vsel %vm746_vm1, %v749_v33, %v751_v34  ;;  %v771_v57 = vadd.s32 1, %v2846_v56  ;;  %v531_v62 = vshll.u32 %v2605_v21, %v2817_v14 }
 0x13f   : > { %v535_v5 = vshrl.u32 %v2607_v30, %v520_v6  ;;  %v518_v11 = vshrl.u32 %v2813_v8, 5  ;;  %v524_v13 = vor.u32 %v523_v32, %v522_v46  ;;  %v527_v16 = vor.u32 %v526_v24, %v525_v50 }
 0x140   : > { %v528_v18 = vshll.u32 %v2604_v19, %v2817_v14  ;;  %vm2148_vm3 = vcmp.lt.s32.totalorder %v2147_v36, 0  ;;  %v677_v22 = vclz %v2154_v37  ;;  %v533_v23 = vor.u32 %v532_v42, %v531_v62 }
 0x141   : > { %v534_v28 = vshll.u32 %v2606_v26, %v2817_v14  ;;  %v768_v12 = vmul.u32 %v761_v10, %v752_v43  ;;  %vm770_vm4 = vc.u32 %v2855_v44, %v2845_v27  ;;  %v513_v29 = vor.u32 8388608, %v512_v25 }
 0x142   : > { %v530_v9 = vor.u32 %v529_v52, %v528_v18  ;;  %v772_v7 = vsel %vm770_vm4, %v771_v57, %v2846_v56  ;;  %v472_v32 = vsel %vm2148_vm3, 0, %v2147_v36  ;;  %vm537_vm5 = vcmp.lt.s32.totalorder %v518_v11, 1 }
 0x143   : > { %v536_v8 = vor.u32 %v535_v5, %v534_v28  ;;  %v773_v33 = vadd.s32 %v772_v7, %v768_v12  ;;  %vm540_vm6 = vcmp.lt.s32.totalorder %v518_v11, 4  ;;  %v2155_v34 = vadd.s32 4294967294, %v677_v22 }
 0x144   : > { %vm539_vm7 = vcmp.lt.s32.totalorder %v518_v11, 3  ;;  %v545_v35 = vsel %vm537_vm5, %v524_v13, %v527_v16  ;;  %v546_v24 = vsel %vm540_vm6, %v533_v23, 920167782  ;;  %v521_v14 = vshrl.u32 %v2602_v15, %v520_v6 }
 0x145   : > { %v774_v37 = vadd.s32 536870912, %v773_v33  ;;  %v547_v10 = vsel %vm539_vm7, %v530_v9, %v546_v24  ;;  %v549_v40 = vsel %vm537_vm5, %v527_v16, %v530_v9  ;;  %v477_v46 = vsub.s32 4294967266, %v472_v32 }
 0x146   : > { %vm538_vm8 = vcmp.lt.s32.totalorder %v518_v11, 2  ;;  %v542_v25 = vsel %vm540_vm6, %v530_v9, 2102212464  ;;  %v550_v56 = vsel %vm540_vm6, %v536_v8, 1326507024  ;;  %v553_v42 = vshll.u32 %v513_v29, 8 }
 0x147   : > { %v2880_v36 = vshrl.u32 %v774_v37, 30  ;;  %v548_v50 = vsel %vm538_vm8, %v545_v35, %v547_v10  ;;  %v551_v52 = vsel %vm539_vm7, %v533_v23, %v550_v56  ;;  %vm2156_vm9 = vcmp.lt.s32.totalorder %v2155_v34, 0 }
 0x148   : > { %v541_v43 = vsel %vm537_vm5, %v521_v14, %v524_v13  ;;  %v552_v6 = vsel %vm538_vm8, %v549_v40, %v551_v52  ;;  %v543_v62 = vsel %vm539_vm7, %v527_v16, %v542_v25  ;;  %v478_v22 = vadd.s32 127, %v477_v46 }
 0x149   : > { %v776_v57 = vshll.u32 %v2880_v36, 30  ;;  %v2888_v5 = vmul.u32.u64.low %v553_v42, %v552_v6  ;;  %v2889_v18 = vmul.u32.u64.high %v553_v42, %v552_v6, %v2888_v5  ;;  %v680_v9 = vsel %vm2156_vm9, 0, %v2155_v34 }
 0x14a   : > { %v2891_v28 = vmul.u32.u64.low %v553_v42, %v548_v50  ;;  %v2892_v12 = vmul.u32.u64.high %v553_v42, %v548_v50, %v2891_v28  ;;  %v473_v7 = vsub.s32 32, %v472_v32  ;;  %v544_v29 = vsel %vm538_vm8, %v541_v43, %v543_v62 }
 0x14b   : > { %v777_v23 = vsub.s32 %v773_v33, %v776_v57  ;;  %v457_v16 = vadd.s32 %v2773_v2, %v2770_v1  ;;  %v479_v8 = vshll.u32 %v478_v22, 23  ;;  %v685_v35 = vsub.s32 4294967266, %v680_v9 }
 0x14c   : > { %vm562_vm10 = vc.u32 %v2889_v18, %v2891_v28  ;;  %v563_v24 = vadd.s32 1, %v2892_v12  ;;  %v560_v14 = vmul.u32 %v553_v42, %v544_v29  ;;  %v474_v11 = vshll.u32 %v2810_v20, %v472_v32 }
 0x14d   : > { %v779_v13 = vsub.s32 0, %v777_v23  ;;  %v475_v10 = vshrl.u32 %v457_v16, %v473_v7  ;;  %v480_v46 = vor.u32 4788187, %v479_v8  ;;  %v686_v25 = vadd.s32 127, %v685_v35 }
 0x14e   : > { %v564_v34 = vsel %vm562_vm10, %v563_v24, %v2892_v12  ;;  %v681_v43 = vsub.s32 32, %v680_v9  ;;  %v665_v42 = vadd.s32 %v2795_v59, %v2800_v0  ;;  %v769_v62 = vadd.s32 %v2845_v27, %v2855_v44 }
 0x14f   : > { %v2158_v37 = vmin.u32 %v779_v13, %v777_v23  ;;  %v565_v40 = vadd.s32 %v564_v34, %v560_v14  ;;  %v476_v52 = vor.u32 %v475_v10, %v474_v11  ;;  %v481_v2 = vand.u32 2147483647, %v480_v46 }
 0x150   : > { %v687_v6 = vshll.u32 %v686_v25, 23  ;;  %v683_v12 = vshrl.u32 %v665_v42, %v681_v43  ;;  %v682_v8 = vshll.u32 %v2834_v53, %v680_v9  ;;  %v817_v53 = vmul.f32 0.35, %v2723_v45 }
 0x151   : > { %v781_v33 = vclz %v2158_v37  ;;  %v566_v50 = vadd.s32 536870912, %v565_v40  ;;  %v483_v22 = vcvt.s32.f32 %v476_v52  ;;  %v818_v52 = vmul.f32 0.35, %v2725_v47 }
 0x152   : > { %v688_v35 = vor.u32 4788187, %v687_v6  ;;  %v684_v14 = vor.u32 %v683_v12, %v682_v8  ;;  %vm2919_vm15 = vcmp.le.f32.partialorder %v401_v51, 0.7853982  ;;  %v561_v42 = vadd.s32 %v2891_v28, %v2889_v18 }
 0x153   : > { %v2159_v56 = vadd.s32 4294967294, %v781_v33  ;;  %v2903_v1 = vshrl.u32 %v566_v50, 30  ;;  %v484_v24 = vmul.f32 %v483_v22, %v481_v2  ;;  %2486 = vtanh.f32 %v817_v53 }
 0x154   : > { %v689_v44 = vand.u32 2147483647, %v688_v35  ;;  %v691_v25 = vcvt.s32.f32 %v684_v14  ;;  %vm2932_vm0 = vcmp.le.f32.partialorder %v713_v3, 0.7853982  ;;  %2488 = vtanh.f32 %v818_v52 }
 0x155   : > { %vm2160_vm11 = vcmp.lt.s32.totalorder %v2159_v56, 0  ;;  %v568_v32 = vshll.u32 %v2903_v1, 30  ;;  %v485_v34 = vxor.u32 2147483648, %v484_v24  ;;  %vm611_vm1 = vcmp.lt.s32.totalorder %v2741_v58, 0 }
 0x156   : > { %v784_v57 = vsel %vm2160_vm11, 0, %v2159_v56  ;;  %v692_v9 = vmul.f32 %v691_v25, %v689_v44  ;;  %v820_v28 = vmul.f32 0.35, %v2743_v60  ;;  %v799_v3 = vsub.s32 4, %v2880_v36 }
 0x157   : > { %v785_v5 = vsub.s32 32, %v784_v57  ;;  %v789_v20 = vsub.s32 4294967266, %v784_v57  ;;  %v786_v7 = vshll.u32 %v777_v23, %v784_v57  ;;  %v569_v16 = vsub.s32 %v565_v40, %v568_v32 }
 0x158   : > { %v486_v40 = vsel %vm403_vm12, %v485_v34, %v484_v24  ;;  %vm2947_vm2 = vcmp.le.f32.partialorder %v609_v61, 0.7853982  ;;  %v695_v61 = vsub.s32 4, %v2821_v31  ;;  %vm507_vm3 = vcmp.lt.s32.totalorder %v2731_v49, 0 }
 0x159   : > { %v787_v29 = vshrl.u32 %v769_v62, %v785_v5  ;;  %v790_v13 = vadd.s32 127, %v789_v20  ;;  %v571_v37 = vsub.s32 0, %v569_v16  ;;  %v693_v62 = vxor.u32 2147483648, %v692_v9 }
 0x15a   : > { %v489_v47 = vsel %vm2919_vm15, %v2728_v48, %v486_v40  ;;  %vm2972_vm4 = vcmp.le.f32.partialorder %v505_v63, 0.7853982  ;;  %v819_v25 = vmul.f32 0.35, %v2735_v54  ;;  %vm597_vm9 = vweird.f32 %v2731_v49 }
 0x15b   : > { %v788_v59 = vor.u32 %v787_v29, %v786_v7  ;;  %v791_v0 = vshll.u32 %v790_v13, 23  ;;  %v2150_v27 = vmin.u32 %v571_v37, %v569_v16  ;;  %v694_v7 = vsel %vm611_vm1, %v693_v62, %v692_v9 }
 0x15c   : > { %v487_v29 = vsub.s32 4, %v2793_v55  ;;  %2490 = vcosq.f32 %v489_v47  ;;  %v697_v35 = vsel %vm2947_vm2, %v2741_v58, %v694_v7  ;;  %v591_v37 = vsub.s32 4, %v2903_v1 }
 0x15d   : > { %v792_v10 = vor.u32 4788187, %v791_v0  ;;  %v795_v11 = vcvt.s32.f32 %v788_v59  ;;  %v573_v46 = vclz %v2150_v27  ;;  %v800_v59 = vsel %vm715_vm14, %v799_v3, %v2880_v36  ;;  %v2487_v14 = vpop.eup %2486 }
 0x15e   : > { %v488_v24 = vsel %vm403_vm12, %v487_v29, %v2793_v55  ;;  %v802_v44 = vsel %vm2932_vm0, 0, %v800_v59  ;;  %v2489_v55 = vpop.eup %2488  ;;  %v696_v36 = vsel %vm611_vm1, %v695_v61, %v2821_v31  ;;  %vm805_vm10 = vweird.f32 %v2750_v4 }
 0x15f   : > { %v793_v33 = vand.u32 2147483647, %v792_v10  ;;  %v2151_v56 = vadd.s32 4294967294, %v573_v46  ;;  %v490_v27 = vsel %vm2919_vm15, 0, %v488_v24  ;;  %v806_v53 = vadd.s32 3, %v802_v44 }
 0x160   : > { %v698_v31 = vsel %vm2947_vm2, 0, %v696_v36  ;;  %vm493_vm2 = vweird.f32 %v2728_v48 }
 0x161   : > { %v796_v23 = vmul.f32 %v795_v11, %v793_v33  ;;  %vm2152_vm13 = vcmp.lt.s32.totalorder %v2151_v56, 0  ;;  %v592_v11 = vsel %vm507_vm3, %v591_v37, %v2903_v1  ;;  %v807_v52 = vand.u32 3, %v806_v53 }
 0x162   : > { %v576_v43 = vsel %vm2152_vm13, 0, %v2151_v56  ;;  %v494_v56 = vadd.s32 3, %v490_v27  ;;  %v594_v40 = vsel %vm2972_vm4, 0, %v592_v11 }
 0x163   : > { %v797_v50 = vxor.u32 2147483648, %v796_v23  ;;  %v577_v6 = vsub.s32 32, %v576_v43  ;;  %v581_v57 = vsub.s32 4294967266, %v576_v43  ;;  %v578_v5 = vshll.u32 %v569_v16, %v576_v43 }
 0x164   : > { %v495_v54 = vand.u32 3, %v494_v56  ;;  %v702_v43 = vadd.s32 3, %v698_v31  ;;  %v598_v2 = vadd.s32 3, %v594_v40  ;;  %vm809_vm6 = vcmp.eq.s32.totalorder %v807_v52, 0 }
 0x165   : > { %v798_v45 = vsel %vm715_vm14, %v797_v50, %v796_v23  ;;  %v579_v20 = vshrl.u32 %v561_v42, %v577_v6  ;;  %v582_v51 = vadd.s32 127, %v581_v57  ;;  %vm812_vm7 = vcmp.eq.s32.totalorder %v807_v52, 2 }
 0x166   : > { %v801_v18 = vsel %vm2932_vm0, %v2750_v4, %v798_v45  ;;  %v2491_v46 = vpop.eup %2490  ;;  %vm497_vm5 = vcmp.eq.s32.totalorder %v495_v54, 0  ;;  %v703_v32 = vand.u32 3, %v702_v43  ;;  %vm500_vm8 = vcmp.eq.s32.totalorder %v495_v54, 2 }
 0x167   : > { %v580_v22 = vor.u32 %v579_v20, %v578_v5  ;;  %v583_v12 = vshll.u32 %v582_v51, 23  ;;  %2492 = vcosq.f32 %v801_v18  ;;  %v501_v62 = vxor.u32 2147483648, %v2491_v46 }
 0x168   : > { %2494 = vsinq.f32 %v801_v18  ;;  %v825_v5 = vadd.f32 1.0, %v2487_v14  ;;  %v826_v51 = vadd.f32 1.0, %v2489_v55  ;;  %v599_v18 = vand.u32 3, %v598_v2 }
 0x169   : > { %v584_v13 = vor.u32 4788187, %v583_v12  ;;  %v587_v8 = vcvt.s32.f32 %v580_v22  ;;  %2496 = vsinq.f32 %v489_v47  ;;  %vm808_vm11 = vcmp.lt.s32.totalorder %v807_v52, 2 }
 0x16a   : > { %2498 = vtanh.f32 %v820_v28  ;;  %v830_v16 = vmul.f32 0.5, %v826_v51  ;;  %vm496_vm12 = vcmp.lt.s32.totalorder %v495_v54, 2  ;;  %vm705_vm13 = vcmp.eq.s32.totalorder %v703_v32, 0 }
 0x16b   : > { %v585_v60 = vand.u32 2147483647, %v584_v13  ;;  %2500 = vcosq.f32 %v697_v35  ;;  %vm604_vm14 = vcmp.eq.s32.totalorder %v599_v18, 2  ;;  %vm708_vm15 = vcmp.eq.s32.totalorder %v703_v32, 2 }
 0x16c   : > { %2502 = vsinq.f32 %v697_v35  ;;  %vm601_vm0 = vcmp.eq.s32.totalorder %v599_v18, 0  ;;  %vm600_vm1 = vcmp.lt.s32.totalorder %v599_v18, 2  ;;  %v829_v11 = vmul.f32 0.5, %v825_v5 }
 0x16d   : > { %v588_v0 = vmul.f32 %v587_v8, %v585_v60 }
 0x16f   : > { %v589_v10 = vxor.u32 2147483648, %v588_v0 }
 0x171   : > { %v590_v33 = vsel %vm507_vm3, %v589_v10, %v588_v0  ;;  %v2493_v9 = vpop.eup %2492  ;;  %vm704_vm3 = vcmp.lt.s32.totalorder %v703_v32, 2 }
 0x172   : > { %v593_v23 = vsel %vm2972_vm4, %v2731_v49, %v590_v33  ;;  %v2495_v63 = vpop.eup %2494  ;;  %v813_v42 = vxor.u32 2147483648, %v2493_v9  ;;  %vm701_vm4 = vweird.f32 %v2741_v58 }
 0x173   : > { %2504 = vcosq.f32 %v593_v23  ;;  %v2497_v1 = vpop.eup %2496  ;;  %v810_v45 = vxor.u32 2147483648, %v2495_v63 }
 0x174   : > { %2506 = vsinq.f32 %v593_v23  ;;  %v2499_v50 = vpop.eup %2498  ;;  %v498_v57 = vxor.u32 2147483648, %v2497_v1  ;;  %v814_v22 = vsel %vm812_vm7, %v813_v42, %v2495_v63  ;;  %v502_v7 = vsel %vm500_vm8, %v501_v62, %v2497_v1 }
 0x175   : > { %2508 = vtanh.f32 %v819_v25  ;;  %v2501_v6 = vpop.eup %2500  ;;  %v828_v20 = vadd.f32 1.0, %v2499_v50  ;;  %v811_v28 = vsel %vm809_vm6, %v2493_v9, %v810_v45  ;;  %v901_v9 = vld [vmem:[%s3739_s4] sm:$0x3] }
 0x176   : > { %v2503_v47 = vpop.eup %2502  ;;  %v499_v12 = vsel %vm497_vm5, %v2491_v46, %v498_v57  ;;  %v709_v3 = vxor.u32 2147483648, %v2501_v6  ;;  %v815_v35 = vsel %vm808_vm11, %v811_v28, %v814_v22  ;;  %v2998_v49 = vrot.slane %v901_v9, %v305_v39 }
 0x177   : > { %v706_v29 = vxor.u32 2147483648, %v2503_v47  ;;  %v503_v59 = vsel %vm496_vm12, %v499_v12, %v502_v7  ;;  %v816_v27 = vsel %vm805_vm10, nan, %v815_v35  ;;  %v832_v36 = vmul.f32 0.5, %v828_v20 }
 0x178   : > { %v710_v14 = vsel %vm708_vm15, %v709_v3, %v2503_v47  ;;  %v504_v55 = vsel %vm493_vm2, nan, %v503_v59  ;;  %v3002_v31 = vrot.slane %v901_v9, %v309_v41 }
 0x179   : > { %v707_v37 = vsel %vm705_vm13, %v2501_v6, %v706_v29  ;;  %v836_v23 = vmul.f32 %v832_v36, %v816_v27  ;;  %v833_v56 = vmul.f32 %v829_v11, %v504_v55 }
 0x17a   : > { %v711_v46 = vsel %vm704_vm3, %v707_v37, %v710_v14 }
 0x17b   : > { %v712_v48 = vsel %vm701_vm4, nan, %v711_v46 }
 0x17d   : > { %v2505_v13 = vpop.eup %2504 }
 0x17e   : > { %v2507_v60 = vpop.eup %2506  ;;  %v605_v8 = vxor.u32 2147483648, %v2505_v13 }
 0x17f   : > { %v602_v24 = vxor.u32 2147483648, %v2507_v60  ;;  %v2509_v61 = vpop.eup %2508 }
 0x180   : > { %v606_v0 = vsel %vm604_vm14, %v605_v8, %v2507_v60  ;;  %v827_v34 = vadd.f32 1.0, %v2509_v61 }
 0x181   : > { %v603_v10 = vsel %vm601_vm0, %v2505_v13, %v602_v24 }
 0x182   : > { %v607_v44 = vsel %vm600_vm1, %v603_v10, %v606_v0  ;;  %v831_v4 = vmul.f32 0.5, %v827_v34 }
 0x183   : > { %v608_v33 = vsel %vm597_vm9, nan, %v607_v44 }
 0x184   : > { %v834_v25 = vmul.f32 %v830_v16, %v608_v33  ;;  %v835_v53 = vmul.f32 %v831_v4, %v712_v48 }
 0x186   : > { %977 = vmatprep.mubr.f32.mxu1 %v834_v25 }
 0x187   : > { %978 = vmatmul.mubr.f32.vlgmr.msra.gmra.mrb[0].mxu1 %v833_v56 }
 0x188   : > { %983 = vmatprep.mubr.f32.mxu1 %v836_v23 }
 0x18b   : > { %984 = vmatmul.mubr.f32.gmra.mrb[2].mxu1 %v835_v53 }
 0x25a   : > { %v979_v58 = vpop.f32.mrb[0].mxu1 }
 0x25b   : > { %v980_v63 = vadd.f32 %v979_v58, %v2998_v49  ;;  %v981_v40 = vpop.f32.mrb[1].mxu1 }
 0x25c   : > { %v3006_v1 = vadd.f32 %v981_v40, %v3002_v31 }
 0x25d   : > { %v3008_v50 = vmul.f32 1.5, %v980_v63  ;;  %v1410_v32 = vmul.f32 0.35, %v980_v63 }
 0x25e   : > { %v3011_v54 = vmul.f32 1.5, %v3006_v1  ;;  %v985_v52 = vpop.f32.mrb[2].mxu1 }
 0x25f   : > { %v994_v39 = vand.u32 2147483647, %v3008_v50  ;;  %v997_v43 = vand.u32 2139095040, %v3008_v50  ;;  %v987_v38 = vpop.f32.mrb[3].mxu1  ;;  %v3022_v62 = vadd.f32 %v985_v52, %v2998_v49  ;;  %2510 = vtanh.f32 %v1410_v32 }
 0x260   : > { %v1098_v41 = vand.u32 2147483647, %v3011_v54  ;;  %v1101_v2 = vand.u32 2139095040, %v3011_v54  ;;  %v3028_v12 = vadd.f32 %v987_v38, %v3002_v31  ;;  %vm996_vm0 = vcmp.lt.s32.totalorder %v3008_v50, 0 }
 0x261   : > { %v998_v45 = vshrl.u32 %v997_v43, 23  ;;  %v1001_v42 = vand.u32 8388607, %v994_v39  ;;  %v3025_v20 = vmul.f32 1.5, %v3022_v62  ;;  %vm3110_vm3 = vcmp.le.f32.partialorder %v994_v39, 0.7853982 }
 0x262   : > { %v1102_v6 = vshrl.u32 %v1101_v2, 23  ;;  %v1105_v57 = vand.u32 8388607, %v1098_v41  ;;  %v3037_v35 = vmul.f32 1.5, %v3028_v12 }
 0x263   : > { %v2161_v47 = vadd.s32 4294967169, %v998_v45  ;;  %v1002_v18 = vor.u32 8388608, %v1001_v42  ;;  %v1202_v7 = vand.u32 2147483647, %v3025_v20  ;;  %v1205_v29 = vand.u32 2139095040, %v3025_v20 }
 0x264   : > { %v2165_v5 = vadd.s32 4294967169, %v1102_v6  ;;  %v1106_v28 = vor.u32 8388608, %v1105_v57 }
 0x265   : > { %v1004_v51 = vadd.s32 1, %v2161_v47  ;;  %v3032_v60 = vshll.u32 %v1002_v18, 8  ;;  %v3039_v61 = vshrl.u32 %v1205_v29, 23  ;;  %v3043_v0 = vand.u32 8388607, %v1202_v7 }
 0x266   : > { %v1108_v22 = vadd.s32 1, %v2165_v5  ;;  %v3034_v8 = vshll.u32 %v1106_v28, 8 }
 0x267   : > { %vm1005_vm5 = vcmp.gt.s32.totalorder %v1004_v51, 0 }
 0x268   : > { %v1006_v3 = vsel %vm1005_vm5, %v1004_v51, 0  ;;  %vm1109_vm6 = vcmp.gt.s32.totalorder %v1108_v22, 0 }
 0x269   : > { %v1008_v13 = vand.u32 31, %v1006_v3  ;;  %v1110_v16 = vsel %vm1109_vm6, %v1108_v22, 0  ;;  %v1007_v24 = vshrl.u32 %v1006_v3, 5  ;;  %v3058_v57 = vpop.eup %2510 }
 0x26a   : > { %v3047_v10 = vshrl.u32 %v1110_v16, 5  ;;  %v1112_v27 = vand.u32 31, %v1110_v16 }
 0x26b   : > { %v1009_v59 = vsub.s32 32, %v1008_v13  ;;  %v1011_v37 = vshll.u32 %v2602_v15, %v1008_v13  ;;  %v1014_v14 = vshll.u32 %v2603_v17, %v1008_v13  ;;  %v1017_v36 = vshll.u32 %v2604_v19, %v1008_v13 }
 0x26c   : > { %v1020_v33 = vshll.u32 %v2605_v21, %v1008_v13  ;;  %v1023_v46 = vshll.u32 %v2606_v26, %v1008_v13  ;;  %vm1026_vm7 = vcmp.lt.s32.totalorder %v1007_v24, 1  ;;  %vm1029_vm8 = vcmp.lt.s32.totalorder %v1007_v24, 4 }
 0x26d   : > { %v1012_v44 = vshrl.u32 %v2603_v17, %v1009_v59  ;;  %v1015_v55 = vshrl.u32 %v2604_v19, %v1009_v59  ;;  %v1018_v34 = vshrl.u32 %v2605_v21, %v1009_v59  ;;  %v1021_v11 = vshrl.u32 %v2606_v26, %v1009_v59 }
 0x26e   : > { %v1024_v25 = vshrl.u32 %v2607_v30, %v1009_v59  ;;  %v1113_v9 = vsub.s32 32, %v1112_v27  ;;  %v1010_v58 = vshrl.u32 %v2602_v15, %v1009_v59  ;;  %vm1027_vm9 = vcmp.lt.s32.totalorder %v1007_v24, 2 }
 0x26f   : > { %v1013_v23 = vor.u32 %v1012_v44, %v1011_v37  ;;  %v1016_v56 = vor.u32 %v1015_v55, %v1014_v14  ;;  %v1019_v48 = vor.u32 %v1018_v34, %v1017_v36  ;;  %v1022_v4 = vor.u32 %v1021_v11, %v1020_v33 }
 0x270   : > { %v1025_v53 = vor.u32 %v1024_v25, %v1023_v46  ;;  %vm1028_vm10 = vcmp.lt.s32.totalorder %v1007_v24, 3  ;;  %v1115_v51 = vshll.u32 %v2602_v15, %v1112_v27  ;;  %v1116_v32 = vshrl.u32 %v2603_v17, %v1113_v9 }
 0x271   : > { %v1031_v63 = vsel %vm1029_vm8, %v1019_v48, 2102212464  ;;  %v1034_v40 = vsel %vm1026_vm7, %v1013_v23, %v1016_v56  ;;  %v1038_v52 = vsel %vm1026_vm7, %v1016_v56, %v1019_v48  ;;  %v1035_v43 = vsel %vm1029_vm8, %v1022_v4, 920167782 }
 0x272   : > { %v1039_v38 = vsel %vm1029_vm8, %v1025_v53, 1326507024  ;;  %v1030_v2 = vsel %vm1026_vm7, %v1010_v58, %v1013_v23  ;;  %v1032_v45 = vsel %vm1028_vm10, %v1016_v56, %v1031_v63  ;;  %v1036_v42 = vsel %vm1028_vm10, %v1019_v48, %v1035_v43 }
 0x273   : > { %v1040_v6 = vsel %vm1028_vm10, %v1022_v4, %v1039_v38  ;;  %v1037_v47 = vsel %vm1027_vm9, %v1034_v40, %v1036_v42  ;;  %v1033_v3 = vsel %vm1027_vm9, %v1030_v2, %v1032_v45  ;;  %v1118_v13 = vshll.u32 %v2603_v17, %v1112_v27 }
 0x274   : > { %v1041_v5 = vsel %vm1027_vm9, %v1038_v52, %v1040_v6  ;;  %v3067_v22 = vmul.u32.u64.low %v3032_v60, %v1037_v47  ;;  %v3068_v29 = vmul.u32.u64.high %v3032_v60, %v1037_v47, %v3067_v22  ;;  %v1119_v16 = vshrl.u32 %v2604_v19, %v1113_v9 }
 0x275   : > { %v3063_v18 = vmul.u32.u64.low %v3032_v60, %v1041_v5  ;;  %v3064_v28 = vmul.u32.u64.high %v3032_v60, %v1041_v5, %v3063_v18  ;;  %v1309_v24 = vand.u32 2139095040, %v3037_v35  ;;  %v1117_v59 = vor.u32 %v1116_v32, %v1115_v51 }
 0x276   : > { %v1121_v37 = vshll.u32 %v2604_v19, %v1112_v27  ;;  %v1122_v14 = vshrl.u32 %v2605_v21, %v1113_v9  ;;  %v1125_v44 = vshrl.u32 %v2606_v26, %v1113_v9  ;;  %v1120_v55 = vor.u32 %v1119_v16, %v1118_v13 }
 0x277   : > { %v1124_v36 = vshll.u32 %v2605_v21, %v1112_v27  ;;  %v1127_v34 = vshll.u32 %v2606_v26, %v1112_v27  ;;  %v1128_v33 = vshrl.u32 %v2607_v30, %v1113_v9  ;;  %v1049_v11 = vmul.u32 %v3032_v60, %v1033_v3 }
 0x278   : > { %vm1051_vm11 = vc.u32 %v3064_v28, %v3067_v22  ;;  %v1052_v46 = vadd.s32 1, %v3068_v29  ;;  %v1123_v25 = vor.u32 %v1122_v14, %v1121_v37  ;;  %vm1130_vm12 = vcmp.lt.s32.totalorder %v3047_v10, 1 }
 0x279   : > { %v1126_v23 = vor.u32 %v1125_v44, %v1124_v36  ;;  %v1129_v56 = vor.u32 %v1128_v33, %v1127_v34  ;;  %vm1133_vm13 = vcmp.lt.s32.totalorder %v3047_v10, 4  ;;  %v1114_v27 = vshrl.u32 %v2602_v15, %v1113_v9 }
 0x27a   : > { %v1053_v48 = vsel %vm1051_vm11, %v1052_v46, %v3068_v29  ;;  %v1135_v4 = vsel %vm1133_vm13, %v1123_v25, 2102212464  ;;  %v1138_v53 = vsel %vm1130_vm12, %v1117_v59, %v1120_v55  ;;  %vm1132_vm14 = vcmp.lt.s32.totalorder %v3047_v10, 3 }
 0x27b   : > { %v1054_v58 = vadd.s32 %v1053_v48, %v1049_v11  ;;  %v1139_v60 = vsel %vm1133_vm13, %v1126_v23, 920167782  ;;  %v1142_v63 = vsel %vm1130_vm12, %v1120_v55, %v1123_v25  ;;  %vm1131_vm15 = vcmp.lt.s32.totalorder %v3047_v10, 2 }
 0x27c   : > { %v1134_v40 = vsel %vm1130_vm12, %v1114_v27, %v1117_v59  ;;  %v1140_v52 = vsel %vm1132_vm14, %v1123_v25, %v1139_v60  ;;  %v1143_v43 = vsel %vm1133_vm13, %v1129_v56, 1326507024  ;;  %v1136_v2 = vsel %vm1132_vm14, %v1120_v55, %v1135_v4 }
 0x27d   : > { %v1055_v38 = vadd.s32 536870912, %v1054_v58  ;;  %v1141_v45 = vsel %vm1131_vm15, %v1138_v53, %v1140_v52  ;;  %v1144_v42 = vsel %vm1132_vm14, %v1126_v23, %v1143_v43  ;;  %v2169_v5 = vadd.s32 4294967169, %v3039_v61 }
 0x27e   : > { %v1145_v6 = vsel %vm1131_vm15, %v1142_v63, %v1144_v42  ;;  %v3091_v47 = vmul.u32.u64.low %v3034_v8, %v1141_v45  ;;  %v3092_v9 = vmul.u32.u64.high %v3034_v8, %v1141_v45, %v3091_v47  ;;  %v1137_v10 = vsel %vm1131_vm15, %v1134_v40, %v1136_v2 }
 0x27f   : > { %v1056_v51 = vshrl.u32 %v1055_v38, 30  ;;  %v3096_v32 = vmul.u32.u64.low %v3034_v8, %v1145_v6  ;;  %v3097_v18 = vmul.u32.u64.high %v3034_v8, %v1145_v6, %v3096_v32  ;;  %v1212_v29 = vadd.s32 1, %v2169_v5 }
 0x280   : > { %v1306_v3 = vand.u32 2147483647, %v3037_v35  ;;  %v1310_v13 = vshrl.u32 %v1309_v24, 23  ;;  %v1411_v37 = vmul.f32 0.35, %v3006_v1  ;;  %v1156_v14 = vadd.s32 1, %v3092_v9 }
 0x281   : > { %v1057_v16 = vshll.u32 %v1056_v51, 30  ;;  %v1080_v59 = vsub.s32 4, %v1056_v51  ;;  %v1210_v61 = vor.u32 8388608, %v3043_v0  ;;  %vm1213_vm1 = vcmp.gt.s32.totalorder %v1212_v29, 0 }
 0x282   : > { %v1153_v55 = vmul.u32 %v3034_v8, %v1137_v10  ;;  %vm1155_vm2 = vc.u32 %v3097_v18, %v3091_v47  ;;  %v2173_v36 = vadd.s32 4294967169, %v1310_v13  ;;  %v1214_v34 = vsel %vm1213_vm1, %v1212_v29, 0 }
 0x283   : > { %v3104_v44 = vsub.s32 %v1054_v58, %v1057_v16  ;;  %v1157_v1 = vsel %vm1155_vm2, %v1156_v14, %v3092_v9  ;;  %v3117_v0 = vand.u32 8388607, %v1306_v3  ;;  %v3122_v8 = vsel %vm996_vm0, %v1080_v59, %v1056_v51 }
 0x284   : > { %v1158_v11 = vadd.s32 %v1157_v1, %v1153_v55  ;;  %v3124_v46 = vshrl.u32 %v1214_v34, 5  ;;  %v1050_v39 = vadd.s32 %v3067_v22, %v3064_v28  ;;  %v3129_v25 = vadd.f32 1.0, %v3058_v57 }
 0x285   : > { %v1060_v33 = vsub.s32 0, %v3104_v44  ;;  %2512 = vtanh.f32 %v1411_v37  ;;  %v1216_v23 = vand.u32 31, %v1214_v34  ;;  %v3132_v27 = vshll.u32 %v1210_v61, 8 }
 0x286   : > { %v1159_v48 = vadd.s32 536870912, %v1158_v11  ;;  %v3134_v4 = vadd.s32 1, %v2173_v36  ;;  %v1083_v53 = vsel %vm3110_vm3, 0, %v3122_v8  ;;  %v3140_v58 = vadd.s32 %v3091_v47, %v3097_v18 }
 0x287   : > { %v2162_v56 = vmin.u32 %v1060_v33, %v3104_v44  ;;  %v1217_v28 = vsub.s32 32, %v1216_v23  ;;  %v1314_v57 = vor.u32 8388608, %v3117_v0  ;;  %v1219_v60 = vshll.u32 %v2602_v15, %v1216_v23 }
 0x288   : > { %v1222_v63 = vshll.u32 %v2603_v17, %v1216_v23  ;;  %vm1234_vm4 = vcmp.lt.s32.totalorder %v3124_v46, 1  ;;  %v3146_v40 = vshrl.u32 %v1159_v48, 30  ;;  %v1225_v38 = vshll.u32 %v2604_v19, %v1216_v23 }
 0x289   : > { %v1062_v22 = vclz %v2162_v56  ;;  %v1220_v52 = vshrl.u32 %v2603_v17, %v1217_v28  ;;  %v1223_v43 = vshrl.u32 %v2604_v19, %v1217_v28  ;;  %v1226_v45 = vshrl.u32 %v2605_v21, %v1217_v28 }
 0x28a   : > { %v1228_v42 = vshll.u32 %v2605_v21, %v1216_v23  ;;  %v1229_v6 = vshrl.u32 %v2606_v26, %v1217_v28  ;;  %vm1317_vm5 = vcmp.gt.s32.totalorder %v3134_v4, 0  ;;  %v1161_v47 = vshll.u32 %v3146_v40, 30 }
 0x28b   : > { %v2163_v2 = vadd.s32 4294967294, %v1062_v22  ;;  %v1218_v9 = vshrl.u32 %v2602_v15, %v1217_v28  ;;  %v1221_v5 = vor.u32 %v1220_v52, %v1219_v60  ;;  %v1224_v51 = vor.u32 %v1223_v43, %v1222_v63 }
 0x28c   : > { %v1227_v32 = vor.u32 %v1226_v45, %v1225_v38  ;;  %v1230_v18 = vor.u32 %v1229_v6, %v1228_v42  ;;  %v1232_v10 = vshrl.u32 %v2607_v30, %v1217_v28  ;;  %v3158_v13 = vsub.s32 %v1158_v11, %v1161_v47 }
 0x28d   : > { %vm2164_vm6 = vcmp.lt.s32.totalorder %v2163_v2, 0  ;;  %v1231_v16 = vshll.u32 %v2606_v26, %v1216_v23  ;;  %vm1235_vm7 = vcmp.lt.s32.totalorder %v3124_v46, 2  ;;  %vm1236_vm8 = vcmp.lt.s32.totalorder %v3124_v46, 3 }
 0x28e   : > { %v1065_v29 = vsel %vm2164_vm6, 0, %v2163_v2  ;;  %v1164_v55 = vsub.s32 0, %v3158_v13  ;;  %vm1237_vm9 = vcmp.lt.s32.totalorder %v3124_v46, 4  ;;  %v1242_v1 = vsel %vm1234_vm4, %v1221_v5, %v1224_v51 }
 0x28f   : > { %v1066_v59 = vsub.s32 32, %v1065_v29  ;;  %v1067_v37 = vshll.u32 %v3104_v44, %v1065_v29  ;;  %v1070_v14 = vsub.s32 4294967266, %v1065_v29  ;;  %v3164_v61 = vpop.eup %2512  ;;  %v1233_v36 = vor.u32 %v1232_v10, %v1231_v16 }
 0x290   : > { %v1239_v8 = vsel %vm1237_vm9, %v1227_v32, 2102212464  ;;  %v1243_v11 = vsel %vm1237_vm9, %v1230_v18, 920167782  ;;  %v2166_v23 = vmin.u32 %v1164_v55, %v3158_v13  ;;  %v1238_v44 = vsel %vm1234_vm4, %v1218_v9, %v1221_v5 }
 0x291   : > { %v1068_v34 = vshrl.u32 %v1050_v39, %v1066_v59  ;;  %v1071_v33 = vadd.s32 127, %v1070_v14  ;;  %v1240_v56 = vsel %vm1236_vm8, %v1224_v51, %v1239_v8  ;;  %v1244_v48 = vsel %vm1236_vm8, %v1227_v32, %v1243_v11 }
 0x292   : > { %v1245_v60 = vsel %vm1235_vm7, %v1242_v1, %v1244_v48  ;;  %v1246_v39 = vsel %vm1234_vm4, %v1224_v51, %v1227_v32  ;;  %v1166_v63 = vclz %v2166_v23  ;;  %v1247_v52 = vsel %vm1237_vm9, %v1233_v36, 1326507024 }
 0x293   : > { %v1069_v28 = vor.u32 %v1068_v34, %v1067_v37  ;;  %v1072_v22 = vshll.u32 %v1071_v33, 23  ;;  %v3182_v43 = vmul.u32.u64.low %v3132_v27, %v1245_v60  ;;  %v3183_v38 = vmul.u32.u64.high %v3132_v27, %v1245_v60, %v3182_v43 }
 0x294   : > { %v1087_v45 = vadd.s32 3, %v1083_v53  ;;  %v1241_v42 = vsel %vm1235_vm7, %v1238_v44, %v1240_v56  ;;  %v1248_v6 = vsel %vm1236_vm8, %v1230_v18, %v1247_v52  ;;  %v2167_v9 = vadd.s32 4294967294, %v1166_v63 }
 0x295   : > { %v1073_v2 = vor.u32 4788187, %v1072_v22  ;;  %v1076_v47 = vcvt.s32.f32 %v1069_v28  ;;  %v1249_v5 = vsel %vm1235_vm7, %v1246_v39, %v1248_v6  ;;  %v1318_v51 = vsel %vm1317_vm5, %v3134_v4, 0 }
 0x296   : > { %v3196_v10 = vmul.u32.u64.low %v3132_v27, %v1249_v5  ;;  %v3197_v29 = vmul.u32.u64.high %v3132_v27, %v1249_v5, %v3196_v10  ;;  %v3199_v53 = vshrl.u32 %v1318_v51, 5  ;;  %vm2168_vm10 = vcmp.lt.s32.totalorder %v2167_v9, 0 }
 0x297   : > { %v1074_v32 = vand.u32 2147483647, %v1073_v2  ;;  %v1260_v16 = vadd.s32 1, %v3183_v38  ;;  %v1320_v18 = vand.u32 31, %v1318_v51  ;;  %v3204_v59 = vshll.u32 %v1314_v57, 8 }
 0x298   : > { %v3206_v37 = vand.u32 3, %v1087_v45  ;;  %v1169_v14 = vsel %vm2168_vm10, 0, %v2167_v9  ;;  %v1257_v4 = vmul.u32 %v3132_v27, %v1241_v42  ;;  %v1184_v34 = vsub.s32 4, %v3146_v40 }
 0x299   : > { %v1077_v46 = vmul.f32 %v1076_v47, %v1074_v32  ;;  %v1170_v55 = vsub.s32 32, %v1169_v14  ;;  %v1174_v36 = vsub.s32 4294967266, %v1169_v14  ;;  %v1321_v1 = vsub.s32 32, %v1320_v18 }
 0x29a   : > { %v1171_v8 = vshll.u32 %v3158_v13, %v1169_v14  ;;  %vm1259_vm11 = vc.u32 %v3197_v29, %v3182_v43  ;;  %vm1338_vm12 = vcmp.lt.s32.totalorder %v3199_v53, 1  ;;  %v1323_v27 = vshll.u32 %v2602_v15, %v1320_v18 }
 0x29b   : > { %v1078_v33 = vxor.u32 2147483648, %v1077_v46  ;;  %v1172_v0 = vshrl.u32 %v3140_v58, %v1170_v55  ;;  %v1175_v57 = vadd.s32 127, %v1174_v36  ;;  %v1261_v11 = vsel %vm1259_vm11, %v1260_v16, %v3183_v38 }
 0x29c   : > { %v1262_v44 = vadd.s32 %v1261_v11, %v1257_v4  ;;  %v1324_v56 = vshrl.u32 %v2603_v17, %v1321_v1  ;;  %v1326_v13 = vshll.u32 %v2603_v17, %v1320_v18  ;;  %v1327_v58 = vshrl.u32 %v2604_v19, %v1321_v1 }
 0x29d   : > { %v1079_v23 = vsel %vm996_vm0, %v1078_v33, %v1077_v46  ;;  %v1173_v28 = vor.u32 %v1172_v0, %v1171_v8  ;;  %v1176_v22 = vshll.u32 %v1175_v57, 23  ;;  %vm1339_vm13 = vcmp.lt.s32.totalorder %v3199_v53, 2 }
 0x29e   : > { %v1082_v48 = vsel %vm3110_vm3, %v3008_v50, %v1079_v23  ;;  %vm1100_vm14 = vcmp.lt.s32.totalorder %v3011_v54, 0  ;;  %v1263_v60 = vadd.s32 536870912, %v1262_v44  ;;  %v1322_v39 = vshrl.u32 %v2602_v15, %v1321_v1 }
 0x29f   : > { %2514 = vcosq.f32 %v1082_v48  ;;  %v1325_v63 = vor.u32 %v1324_v56, %v1323_v27  ;;  %v1177_v52 = vor.u32 4788187, %v1176_v22  ;;  %v1328_v38 = vor.u32 %v1327_v58, %v1326_v13 }
 0x2a0   : > { %2516 = vsinq.f32 %v1082_v48  ;;  %v1329_v2 = vshll.u32 %v2604_v19, %v1320_v18  ;;  %v3229_v24 = vshrl.u32 %v1263_v60, 30  ;;  %v1330_v45 = vshrl.u32 %v2605_v21, %v1321_v1 }
 0x2a1   : > { %v1332_v42 = vshll.u32 %v2605_v21, %v1320_v18  ;;  %v1333_v6 = vshrl.u32 %v2606_v26, %v1321_v1  ;;  %vm3236_vm15 = vcmp.le.f32.partialorder %v1098_v41, 0.7853982  ;;  %v1178_v9 = vand.u32 2147483647, %v1177_v52 }
 0x2a2   : > { %v1180_v5 = vcvt.s32.f32 %v1173_v28  ;;  %v1335_v51 = vshll.u32 %v2606_v26, %v1320_v18  ;;  %v1336_v32 = vshrl.u32 %v2607_v30, %v1321_v1  ;;  %v1265_v10 = vshll.u32 %v3229_v24, 30 }
 0x2a3   : > { %v1331_v16 = vor.u32 %v1330_v45, %v1329_v2  ;;  %v1334_v46 = vor.u32 %v1333_v6, %v1332_v42  ;;  %vm1340_vm0 = vcmp.lt.s32.totalorder %v3199_v53, 3  ;;  %vm1341_vm1 = vcmp.lt.s32.totalorder %v3199_v53, 4 }
 0x2a4   : > { %v1181_v14 = vmul.f32 %v1180_v5, %v1178_v9  ;;  %v1337_v4 = vor.u32 %v1336_v32, %v1335_v51  ;;  %v1346_v41 = vsel %vm1338_vm12, %v1325_v63, %v1328_v38  ;;  %vm1089_vm2 = vcmp.lt.s32.totalorder %v3206_v37, 2 }
 0x2a5   : > { %v3248_v55 = vsub.s32 %v1262_v44, %v1265_v10  ;;  %v1343_v18 = vsel %vm1341_vm1, %v1331_v16, 2102212464  ;;  %v1347_v36 = vsel %vm1341_vm1, %v1334_v46, 920167782  ;;  %v1350_v1 = vsel %vm1338_vm12, %v1328_v38, %v1331_v16 }
 0x2a6   : > { %v1182_v33 = vxor.u32 2147483648, %v1181_v14  ;;  %v1342_v8 = vsel %vm1338_vm12, %v1322_v39, %v1325_v63  ;;  %v1348_v0 = vsel %vm1340_vm0, %v1331_v16, %v1347_v36  ;;  %v1351_v57 = vsel %vm1341_vm1, %v1337_v4, 1326507024 }
 0x2a7   : > { %v1268_v11 = vsub.s32 0, %v3248_v55  ;;  %v1344_v27 = vsel %vm1340_vm0, %v1328_v38, %v1343_v18  ;;  %v1349_v23 = vsel %vm1339_vm13, %v1346_v41, %v1348_v0  ;;  %v1352_v44 = vsel %vm1340_vm0, %v1334_v46, %v1351_v57 }
 0x2a8   : > { %v1183_v56 = vsel %vm1100_vm14, %v1182_v33, %v1181_v14  ;;  %v1353_v13 = vsel %vm1339_vm13, %v1350_v1, %v1352_v44  ;;  %v3268_v48 = vmul.u32.u64.low %v3204_v59, %v1349_v23  ;;  %v3269_v28 = vmul.u32.u64.high %v3204_v59, %v1349_v23, %v3268_v48 }
 0x2a9   : > { %v2515_v22 = vpop.eup %2514  ;;  %vm1090_vm3 = vcmp.eq.s32.totalorder %v3206_v37, 0  ;;  %v2170_v58 = vmin.u32 %v1268_v11, %v3248_v55  ;;  %v3275_v60 = vmul.u32.u64.low %v3204_v59, %v1353_v13  ;;  %v3276_v39 = vmul.u32.u64.high %v3204_v59, %v1353_v13, %v3275_v60 }
 0x2aa   : > { %v2517_v63 = vpop.eup %2516  ;;  %v1094_v52 = vxor.u32 2147483648, %v2515_v22  ;;  %v1345_v38 = vsel %vm1339_vm13, %v1342_v8, %v1344_v27  ;;  %v1185_v2 = vsel %vm1100_vm14, %v1184_v34, %v3146_v40  ;;  %v1186_v45 = vsel %vm3236_vm15, %v3011_v54, %v1183_v56 }
 0x2ab   : > { %v1091_v42 = vxor.u32 2147483648, %v2517_v63  ;;  %vm1093_vm4 = vcmp.eq.s32.totalorder %v3206_v37, 2  ;;  %v1270_v6 = vclz %v2170_v58  ;;  %2518 = vcosq.f32 %v1186_v45 }
 0x2ac   : > { %v1095_v9 = vsel %vm1093_vm4, %v1094_v52, %v2517_v63  ;;  %v1364_v5 = vadd.s32 1, %v3269_v28  ;;  %v1187_v53 = vsel %vm3236_vm15, 0, %v1185_v2  ;;  %2520 = vsinq.f32 %v1186_v45 }
 0x2ad   : > { %v1092_v51 = vsel %vm1090_vm3, %v2515_v22, %v1091_v42  ;;  %v2171_v40 = vadd.s32 4294967294, %v1270_v6  ;;  %v1361_v34 = vmul.u32 %v3204_v59, %v1345_v38  ;;  %vm1363_vm5 = vc.u32 %v3276_v39, %v3268_v48 }
 0x2ae   : > { %vm1086_vm6 = vweird.f32 %v3008_v50  ;;  %v1096_v32 = vsel %vm1089_vm2, %v1092_v51, %v1095_v9  ;;  %v1422_v10 = vmul.f32 0.5, %v3129_v25  ;;  %v1365_v47 = vsel %vm1363_vm5, %v1364_v5, %v3269_v28 }
 0x2af   : > { %v1097_v16 = vsel %vm1086_vm6, nan, %v1096_v32  ;;  %vm2172_vm7 = vcmp.lt.s32.totalorder %v2171_v40, 0  ;;  %v1366_v46 = vadd.s32 %v1365_v47, %v1361_v34  ;;  %v1191_v14 = vadd.s32 3, %v1187_v53  ;;  %v1949_v47 = vld [vmem:[%s3740_s5 + $0x10] sm:$0xff] }
 0x2b0   : > { %v1426_v4 = vmul.f32 %v1422_v10, %v1097_v16  ;;  %v1273_v41 = vsel %vm2172_vm7, 0, %v2171_v40  ;;  %v1258_v59 = vadd.s32 %v3182_v43, %v3197_v29  ;;  %v1419_v23 = vadd.f32 1.0, %v3164_v61 }
 0x2b1   : > { %v1274_v18 = vsub.s32 32, %v1273_v41  ;;  %v1278_v36 = vsub.s32 4294967266, %v1273_v41  ;;  %v1367_v1 = vadd.s32 536870912, %v1366_v46  ;;  %v1192_v8 = vand.u32 3, %v1191_v14 }
 0x2b2   : > { %v1275_v25 = vshll.u32 %v3248_v55, %v1273_v41  ;;  %vm1190_vm11 = vweird.f32 %v3011_v54  ;;  %v1423_v52 = vmul.f32 0.5, %v1419_v23  ;;  %vm1204_vm13 = vcmp.lt.s32.totalorder %v3025_v20, 0 }
 0x2b3   : > { %v1276_v50 = vshrl.u32 %v1258_v59, %v1274_v18  ;;  %v1279_v33 = vadd.s32 127, %v1278_v36  ;;  %v3304_v37 = vshrl.u32 %v1367_v1, 30  ;;  %vm1197_vm8 = vcmp.eq.s32.totalorder %v1192_v8, 2 }
 0x2b4   : > { %vm1194_vm9 = vcmp.eq.s32.totalorder %v1192_v8, 0  ;;  %vm1193_vm10 = vcmp.lt.s32.totalorder %v1192_v8, 2  ;;  %v1362_v53 = vadd.s32 %v3268_v48, %v3276_v39  ;;  %vm3317_vm14 = vcmp.le.f32.partialorder %v1202_v7, 0.7853982 }
 0x2b5   : > { %v2519_v0 = vpop.eup %2518  ;;  %v1280_v57 = vshll.u32 %v1279_v33, 23  ;;  %v1369_v11 = vshll.u32 %v3304_v37, 30  ;;  %v1277_v44 = vor.u32 %v1276_v50, %v1275_v25  ;;  %v1288_v14 = vsub.s32 4, %v3229_v24 }
 0x2b6   : > { %v2521_v27 = vpop.eup %2520  ;;  %v1198_v56 = vxor.u32 2147483648, %v2519_v0  ;;  %v1413_v18 = vmul.f32 0.35, %v3028_v12  ;;  %v1392_v7 = vsub.s32 4, %v3304_v37  ;;  %v1412_v1 = vmul.f32 0.35, %v3022_v62 }
 0x2b7   : > { %v1281_v43 = vor.u32 4788187, %v1280_v57  ;;  %v1370_v29 = vsub.s32 %v1366_v46, %v1369_v11  ;;  %v1195_v13 = vxor.u32 2147483648, %v2521_v27  ;;  %v1284_v55 = vcvt.s32.f32 %v1277_v44 }
 0x2b8   : > { %v1199_v28 = vsel %vm1197_vm8, %v1198_v56, %v2521_v27  ;;  %v1289_v36 = vsel %vm1204_vm13, %v1288_v14, %v3229_v24  ;;  %vm1308_vm15 = vcmp.lt.s32.totalorder %v3037_v35, 0  ;;  %vm1307_vm0 = vcmp.le.f32.partialorder %v1306_v3, 0.7853982 }
 0x2b9   : > { %v1282_v22 = vand.u32 2147483647, %v1281_v43  ;;  %v1372_v58 = vsub.s32 0, %v1370_v29  ;;  %v1196_v60 = vsel %vm1194_vm9, %v2519_v0, %v1195_v13  ;;  %v1291_v33 = vsel %vm3317_vm14, 0, %v1289_v36  ;;  %v1952_v36 = vld [vmem:[%s3740_s5 + $0x28] sm:$0xff] }
 0x2ba   : > { %v1200_v63 = vsel %vm1193_vm10, %v1196_v60, %v1199_v28  ;;  %v1393_v12 = vsel %vm1308_vm15, %v1392_v7, %v3304_v37  ;;  %v1295_v24 = vadd.s32 3, %v1291_v33  ;;  %vm1294_vm7 = vweird.f32 %v3025_v20  ;;  %v1951_v7 = vld [vmem:[%s3740_s5 + $0x20] sm:$0xff] }
 0x2bb   : > { %v2174_v38 = vmin.u32 %v1372_v58, %v1370_v29  ;;  %v1201_v2 = vsel %vm1190_vm11, nan, %v1200_v63  ;;  %v1285_v61 = vmul.f32 %v1284_v55, %v1282_v22  ;;  %v1395_v62 = vsel %vm1307_vm0, 0, %v1393_v12 }
 0x2bc   : > { %v1427_v45 = vmul.f32 %v1423_v52, %v1201_v2  ;;  %v1399_v11 = vadd.s32 3, %v1395_v62  ;;  %v1296_v27 = vand.u32 3, %v1295_v24  ;;  %vm1398_vm8 = vweird.f32 %v3037_v35  ;;  %v1970_v24 = vld [vmem:[%s3740_s5 + $0xb8] sm:$0xff]  ;;  %v1953_v62 = vld [vmem:[%s3740_s5 + $0x30] sm:$0xff] }
 0x2bd   : > { %v1374_v42 = vclz %v2174_v38  ;;  %v1286_v9 = vxor.u32 2147483648, %v1285_v61 }
 0x2be   : > { %1494 = vmatprep.mubr.f32.mxu0 %v1427_v45  ;;  %v1400_v43 = vand.u32 3, %v1399_v11  ;;  %vm1298_vm1 = vcmp.eq.s32.totalorder %v1296_v27, 0  ;;  %vm1301_vm2 = vcmp.eq.s32.totalorder %v1296_v27, 2  ;;  %vm1297_vm3 = vcmp.lt.s32.totalorder %v1296_v27, 2 }
 0x2bf   : > { %v2175_v6 = vadd.s32 4294967294, %v1374_v42  ;;  %1495 = vmatmul.mubr.f32.vlgmr.msra.gmra.mrb[4].mxu0 %v1426_v4  ;;  %v1287_v40 = vsel %vm1204_vm13, %v1286_v9, %v1285_v61 }
 0x2c0   : > { %v1290_v48 = vsel %vm3317_vm14, %v3025_v20, %v1287_v40  ;;  %vm1405_vm4 = vcmp.eq.s32.totalorder %v1400_v43, 2  ;;  %vm1402_vm5 = vcmp.eq.s32.totalorder %v1400_v43, 0  ;;  %vm1401_vm6 = vcmp.lt.s32.totalorder %v1400_v43, 2 }
 0x2c1   : > { %vm2176_vm12 = vcmp.lt.s32.totalorder %v2175_v6, 0  ;;  %2522 = vcosq.f32 %v1290_v48 }
 0x2c2   : > { %v1377_v5 = vsel %vm2176_vm12, 0, %v2175_v6  ;;  %2524 = vsinq.f32 %v1290_v48 }
 0x2c3   : > { %v1378_v51 = vsub.s32 32, %v1377_v5  ;;  %v1382_v54 = vsub.s32 4294967266, %v1377_v5  ;;  %v1379_v34 = vshll.u32 %v1370_v29, %v1377_v5  ;;  %2526 = vtanh.f32 %v1413_v18 }
 0x2c4   : > { %2528 = vtanh.f32 %v1412_v1 }
 0x2c5   : > { %v1380_v32 = vshrl.u32 %v1362_v53, %v1378_v51  ;;  %v1383_v10 = vadd.s32 127, %v1382_v54  ;;  %v1963_v53 = vld [vmem:[%s3740_s5 + $0x80] sm:$0xff]  ;;  %v1964_v51 = vld [vmem:[%s3740_s5 + $0x88] sm:$0xff] }
 0x2c6   : > { %v2362_v20 = vpack.c.bf16 %v1964_v51, %v1963_v53  ;;  %v1948_v54 = vld [vmem:[%s3740_s5 + $0x8] sm:$0xff]  ;;  %v1959_v53 = vld [vmem:[%s3740_s5 + $0x60] sm:$0xff] }
 0x2c7   : > { %v1381_v16 = vor.u32 %v1380_v32, %v1379_v34  ;;  %v1384_v46 = vshll.u32 %v1383_v10, 23  ;;  %v1965_v34 = vld [vmem:[%s3740_s5 + $0x90] sm:$0xff]  ;;  %v1966_v32 = vld [vmem:[%s3740_s5 + $0x98] sm:$0xff]  ;;  %v1960_v51 = vld [vmem:[%s3740_s5 + $0x68] sm:$0xff] }
 0x2c8   : > { %2363 = vmatprep.subr.bf16.mxu0 %v2362_v20  ;;  %2394 = vmatprep.subr.bf16.mxu1 %v2362_v20  ;;  %v2366_v10 = vpack.c.bf16 %v1966_v32, %v1965_v34  ;;  %v1977_v20 = vld [vmem:[%s3740_s5 + $0xf0] sm:$0xff]  ;;  %v1962_v34 = vld [vmem:[%s3740_s5 + $0x78] sm:$0xff] }
 0x2c9   : > { %v1385_v39 = vor.u32 4788187, %v1384_v46  ;;  %v1388_v41 = vcvt.s32.f32 %v1381_v16  ;;  %v1950_v16 = vld [vmem:[%s3740_s5 + $0x18] sm:$0xff] }
 0x2ca   : > { %v2368_v46 = vpack.c.bf16 %v1950_v16, %v1949_v47 }
 0x2cb   : > { %v1386_v4 = vand.u32 2147483647, %v1385_v39  ;;  %v2523_v0 = vpop.eup %2522 }
 0x2cc   : > { %v2525_v57 = vpop.eup %2524  ;;  %v1302_v44 = vxor.u32 2147483648, %v2523_v0 }
 0x2cd   : > { %v1389_v59 = vmul.f32 %v1388_v41, %v1386_v4  ;;  %v1299_v23 = vxor.u32 2147483648, %v2525_v57  ;;  %v2527_v56 = vpop.eup %2526  ;;  %v1967_v4 = vld [vmem:[%s3740_s5 + $0xa0] sm:$0xff]  ;;  %v1968_v41 = vld [vmem:[%s3740_s5 + $0xa8] sm:$0xff] }
 0x2ce   : > { %v2529_v3 = vpop.eup %2528  ;;  %v1303_v37 = vsel %vm1301_vm2, %v1302_v44, %v2525_v57  ;;  %v1421_v22 = vadd.f32 1.0, %v2527_v56  ;;  %v2370_v18 = vpack.c.bf16 %v1968_v41, %v1967_v4  ;;  %v1954_v57 = vld [vmem:[%s3740_s5 + $0x38] sm:$0xff] }
 0x2cf   : > { %v1390_v50 = vxor.u32 2147483648, %v1389_v59  ;;  %v1300_v29 = vsel %vm1298_vm1, %v2523_v0, %v1299_v23  ;;  %v1420_v60 = vadd.f32 1.0, %v2529_v3  ;;  %v1971_v23 = vld [vmem:[%s3740_s5 + $0xc0] sm:$0xff]  ;;  %v2376_v3 = vpack.c.bf16 %v1954_v57, %v1953_v62 }
 0x2d0   : > { %v1304_v63 = vsel %vm1297_vm3, %v1300_v29, %v1303_v37  ;;  %v1425_v61 = vmul.f32 0.5, %v1421_v22  ;;  %v1972_v29 = vld [vmem:[%s3740_s5 + $0xc8] sm:$0xff]  ;;  %v1955_v37 = vld [vmem:[%s3740_s5 + $0x40] sm:$0xff] }
 0x2d1   : > { %v1391_v8 = vsel %vm1308_vm15, %v1390_v50, %v1389_v59  ;;  %v1305_v45 = vsel %vm1294_vm7, nan, %v1304_v63  ;;  %v1424_v6 = vmul.f32 0.5, %v1420_v60  ;;  %v2372_v50 = vpack.c.bf16 %v1952_v36, %v1951_v7  ;;  %v1974_v60 = vld [vmem:[%s3740_s5 + $0xd8] sm:$0xff] }
 0x2d2   : > { %v1394_v25 = vsel %vm1307_vm0, %v3037_v35, %v1391_v8  ;;  %v1947_v35 = vld [vmem:[%s3740_s5] sm:$0xff]  ;;  %v2378_v22 = vpack.c.bf16 %v1972_v29, %v1971_v23 }
 0x2d3   : > { %2530 = vcosq.f32 %v1394_v25  ;;  %v1428_v5 = vmul.f32 %v1424_v6, %v1305_v45  ;;  %v2364_v40 = vpack.c.bf16 %v1948_v54, %v1947_v35  ;;  %v1958_v6 = vld [vmem:[%s3740_s5 + $0x58] sm:$0xff] }
 0x2d4   : > { %2532 = vsinq.f32 %v1394_v25  ;;  %v1969_v25 = vld [vmem:[%s3740_s5 + $0xb0] sm:$0xff]  ;;  %v1978_v54 = vld [vmem:[%s3740_s5 + $0xf8] sm:$0xff] }
 0x2d5   : > { %2365 = vmatpush3.bf16.msra.mxu0 %v2364_v40  ;;  %2402 = vmatpush3.bf16.msra.mxu1 %v2364_v40  ;;  %v2374_v43 = vpack.c.bf16 %v1970_v24, %v1969_v25  ;;  %v1961_v40 = vld [vmem:[%s3740_s5 + $0x70] sm:$0xff] }
 0x2d6   : > { %2367 = vmatprep.subr.bf16.mxu0 %v2366_v10  ;;  %2395 = vmatprep.subr.bf16.mxu1 %v2366_v10  ;;  %v2392_v7 = vpack.c.bf16 %v1962_v34, %v1961_v40 }
 0x2d9   : > { %2369 = vmatpush3.bf16.msra.mxu0 %v2368_v46  ;;  %2403 = vmatpush3.bf16.msra.mxu1 %v2368_v46 }
 0x2da   : > { %2371 = vmatprep.subr.bf16.mxu0 %v2370_v18  ;;  %2396 = vmatprep.subr.bf16.mxu1 %v2370_v18  ;;  %v2390_v18 = vpack.c.bf16 %v1978_v54, %v1977_v20 }
 0x2dd   : > { %v2531_v13 = vpop.eup %2530  ;;  %2373 = vmatpush3.bf16.msra.mxu0 %v2372_v50  ;;  %2404 = vmatpush3.bf16.msra.mxu1 %v2372_v50 }
 0x2de   : > { %v2533_v28 = vpop.eup %2532  ;;  %v1406_v58 = vxor.u32 2147483648, %v2531_v13  ;;  %2375 = vmatprep.subr.bf16.mxu0 %v2374_v43  ;;  %2397 = vmatprep.subr.bf16.mxu1 %v2374_v43 }
 0x2df   : > { %v1403_v55 = vxor.u32 2147483648, %v2533_v28 }
 0x2e0   : > { %v1407_v52 = vsel %vm1405_vm4, %v1406_v58, %v2533_v28  ;;  %v1973_v58 = vld [vmem:[%s3740_s5 + $0xd0] sm:$0xff] }
 0x2e1   : > { %v1404_v38 = vsel %vm1402_vm5, %v2531_v13, %v1403_v55  ;;  %v1956_v13 = vld [vmem:[%s3740_s5 + $0x48] sm:$0xff]  ;;  %2377 = vmatpush3.bf16.msra.mxu0 %v2376_v3  ;;  %2405 = vmatpush3.bf16.msra.mxu1 %v2376_v3 }
 0x2e2   : > { %v1408_v2 = vsel %vm1401_vm6, %v1404_v38, %v1407_v52  ;;  %v2380_v38 = vpack.c.bf16 %v1956_v13, %v1955_v37  ;;  %2379 = vmatprep.subr.bf16.mxu0 %v2378_v22  ;;  %2398 = vmatprep.subr.bf16.mxu1 %v2378_v22 }
 0x2e3   : > { %v1409_v42 = vsel %vm1398_vm8, nan, %v1408_v2  ;;  %v1957_v2 = vld [vmem:[%s3740_s5 + $0x50] sm:$0xff] }
 0x2e4   : > { %v1429_v9 = vmul.f32 %v1425_v61, %v1409_v42  ;;  %v2382_v42 = vpack.c.bf16 %v1974_v60, %v1973_v58  ;;  %v2384_v47 = vpack.c.bf16 %v1958_v6, %v1957_v2 }
 0x2e5   : > { %2381 = vmatpush3.bf16.msra.mxu0 %v2380_v38  ;;  %2406 = vmatpush3.bf16.msra.mxu1 %v2380_v38 }
 0x2e6   : > { %1500 = vmatprep.mubr.f32.mxu0 %v1429_v9  ;;  %v1975_v9 = vld [vmem:[%s3740_s5 + $0xe0] sm:$0xff]  ;;  %2383 = vmatprep.subr.bf16.mxu0 %v2382_v42 }
 0x2e7   : > { %1501 = vmatmul.mubr.f32.gmra.mrb[6].mxu0 %v1428_v5  ;;  %v1976_v5 = vld [vmem:[%s3740_s5 + $0xe8] sm:$0xff]  ;;  %2399 = vmatprep.subr.bf16.mxu1 %v2382_v42 }
 0x2e9   : > { %2385 = vmatpush3.bf16.msra.mxu0 %v2384_v47  ;;  %2407 = vmatpush3.bf16.msra.mxu1 %v2384_v47 }
 0x392   : > { %v1496_v48 = vpop.f32.mrb[4].mxu0 }
 0x393   : > { %v3365_v39 = vadd.f32 %v1496_v48, %v2998_v49  ;;  %v1498_v14 = vpop.f32.mrb[5].mxu0  ;;  %v2386_v48 = vpack.c.bf16 %v1976_v5, %v1975_v9 }
 0x394   : > { %v3374_v59 = vadd.f32 %v1498_v14, %v3002_v31  ;;  %v2388_v14 = vpack.c.bf16 %v1960_v51, %v1959_v53 }
 0x395   : > { %v3383_v1 = vmul.f32 1.5, %v3365_v39  ;;  %2387 = vmatprep.subr.bf16.mxu0 %v2386_v48  ;;  %2400 = vmatprep.subr.bf16.mxu1 %v2386_v48 }
 0x396   : > { %v3386_v33 = vmul.f32 1.5, %v3374_v59  ;;  %2389 = vmatpush3.bf16.msra.mxu0 %v2388_v14  ;;  %2408 = vmatpush3.bf16.msra.mxu1 %v2388_v14 }
 0x397   : > { %v1511_v8 = vand.u32 2147483647, %v3383_v1  ;;  %v1514_v12 = vand.u32 2139095040, %v3383_v1  ;;  %2391 = vmatprep.subr.bf16.mxu0 %v2390_v18  ;;  %2401 = vmatprep.subr.bf16.mxu1 %v2390_v18  ;;  %vm1513_vm5 = vcmp.lt.s32.totalorder %v3383_v1, 0 }
 0x398   : > { %v1618_v0 = vand.u32 2139095040, %v3386_v33  ;;  %v1615_v27 = vand.u32 2147483647, %v3386_v33 }
 0x399   : > { %v1515_v11 = vshrl.u32 %v1514_v12, 23  ;;  %v1518_v44 = vand.u32 8388607, %v1511_v8  ;;  %vm3543_vm6 = vcmp.le.f32.partialorder %v1511_v8, 0.7853982 }
 0x39a   : > { %v1619_v56 = vshrl.u32 %v1618_v0, 23  ;;  %v1622_v52 = vand.u32 8388607, %v1615_v27  ;;  %2393 = vmatpush3.bf16.msra.mxu0 %v2392_v7  ;;  %2409 = vmatpush3.bf16.msra.mxu1 %v2392_v7 }
 0x39b   : > { %v2177_v28 = vadd.s32 4294967169, %v1515_v11  ;;  %v1519_v61 = vor.u32 8388608, %v1518_v44 }
 0x39c   : > { %v2181_v55 = vadd.s32 4294967169, %v1619_v56  ;;  %v1623_v46 = vor.u32 8388608, %v1622_v52 }
 0x39d   : > { %v1521_v63 = vadd.s32 1, %v2177_v28  ;;  %v3458_v16 = vshll.u32 %v1519_v61, 8 }
 0x39e   : > { %v1625_v45 = vadd.s32 1, %v2181_v55  ;;  %v3471_v56 = vshll.u32 %v1623_v46, 8 }
 0x39f   : > { %vm1522_vm9 = vcmp.gt.s32.totalorder %v1521_v63, 0 }
 0x3a0   : > { %v1523_v35 = vsel %vm1522_vm9, %v1521_v63, 0  ;;  %vm1626_vm10 = vcmp.gt.s32.totalorder %v1625_v45, 0 }
 0x3a1   : > { %v1525_v32 = vand.u32 31, %v1523_v35  ;;  %v3456_v10 = vsel %vm1626_vm10, %v1625_v45, 0  ;;  %v1524_v4 = vshrl.u32 %v1523_v35, 5 }
 0x3a2   : > { %v1629_v25 = vand.u32 31, %v3456_v10  ;;  %v1628_v40 = vshrl.u32 %v3456_v10, 5 }
 0x3a3   : > { %v1526_v41 = vsub.s32 32, %v1525_v32  ;;  %v1528_v36 = vshll.u32 %v2602_v15, %v1525_v32  ;;  %v1531_v50 = vshll.u32 %v2603_v17, %v1525_v32  ;;  %v1534_v12 = vshll.u32 %v2604_v19, %v1525_v32 }
 0x3a4   : > { %v1537_v57 = vshll.u32 %v2605_v21, %v1525_v32  ;;  %v1540_v23 = vshll.u32 %v2606_v26, %v1525_v32  ;;  %vm1543_vm11 = vcmp.lt.s32.totalorder %v1524_v4, 1  ;;  %vm1546_vm12 = vcmp.lt.s32.totalorder %v1524_v4, 4 }
 0x3a5   : > { %v1529_v24 = vshrl.u32 %v2603_v17, %v1526_v41  ;;  %v1532_v0 = vshrl.u32 %v2604_v19, %v1526_v41  ;;  %v1535_v62 = vshrl.u32 %v2605_v21, %v1526_v41  ;;  %v1538_v11 = vshrl.u32 %v2606_v26, %v1526_v41 }
 0x3a6   : > { %v1541_v44 = vshrl.u32 %v2607_v30, %v1526_v41  ;;  %v1630_v28 = vsub.s32 32, %v1629_v25  ;;  %v1527_v22 = vshrl.u32 %v2602_v15, %v1526_v41  ;;  %vm1544_vm13 = vcmp.lt.s32.totalorder %v1524_v4, 2 }
 0x3a7   : > { %v1530_v43 = vor.u32 %v1529_v24, %v1528_v36  ;;  %v1533_v3 = vor.u32 %v1532_v0, %v1531_v50  ;;  %v1536_v29 = vor.u32 %v1535_v62, %v1534_v12  ;;  %v1539_v37 = vor.u32 %v1538_v11, %v1537_v57 }
 0x3a8   : > { %v1542_v13 = vor.u32 %v1541_v44, %v1540_v23  ;;  %vm1545_vm14 = vcmp.lt.s32.totalorder %v1524_v4, 3  ;;  %v1632_v9 = vshll.u32 %v2602_v15, %v1629_v25  ;;  %v1633_v5 = vshrl.u32 %v2603_v17, %v1630_v28 }
 0x3a9   : > { %v1548_v58 = vsel %vm1546_vm12, %v1536_v29, 2102212464  ;;  %v1551_v60 = vsel %vm1543_vm11, %v1530_v43, %v1533_v3  ;;  %v1555_v55 = vsel %vm1543_vm11, %v1533_v3, %v1536_v29  ;;  %v1552_v63 = vsel %vm1546_vm12, %v1539_v37, 920167782 }
 0x3aa   : > { %v1556_v52 = vsel %vm1546_vm12, %v1542_v13, 1326507024  ;;  %v1547_v38 = vsel %vm1543_vm11, %v1527_v22, %v1530_v43  ;;  %v1549_v2 = vsel %vm1545_vm14, %v1533_v3, %v1548_v58  ;;  %v1553_v61 = vsel %vm1545_vm14, %v1536_v29, %v1552_v63 }
 0x3ab   : > { %v1557_v45 = vsel %vm1545_vm14, %v1539_v37, %v1556_v52  ;;  %v1554_v42 = vsel %vm1544_vm13, %v1551_v60, %v1553_v61  ;;  %v1550_v54 = vsel %vm1544_vm13, %v1547_v38, %v1549_v2  ;;  %v1635_v34 = vshll.u32 %v2603_v17, %v1629_v25 }
 0x3ac   : > { %v1558_v6 = vsel %vm1544_vm13, %v1555_v55, %v1557_v45  ;;  %v3486_v20 = vmul.u32.u64.low %v3458_v16, %v1554_v42  ;;  %v3487_v35 = vmul.u32.u64.high %v3458_v16, %v1554_v42, %v3486_v20  ;;  %v1636_v32 = vshrl.u32 %v2604_v19, %v1630_v28 }
 0x3ad   : > { %v3482_v53 = vmul.u32.u64.low %v3458_v16, %v1558_v6  ;;  %v3483_v51 = vmul.u32.u64.high %v3458_v16, %v1558_v6, %v3482_v53  ;;  %v1634_v47 = vor.u32 %v1633_v5, %v1632_v9  ;;  %v1638_v46 = vshll.u32 %v2604_v19, %v1629_v25 }
 0x3ae   : > { %v1639_v48 = vshrl.u32 %v2605_v21, %v1630_v28  ;;  %v1642_v14 = vshrl.u32 %v2606_v26, %v1630_v28  ;;  %v1637_v41 = vor.u32 %v1636_v32, %v1635_v34  ;;  %v1641_v18 = vshll.u32 %v2605_v21, %v1629_v25 }
 0x3af   : > { %v1644_v4 = vshll.u32 %v2606_v26, %v1629_v25  ;;  %v1645_v36 = vshrl.u32 %v2607_v30, %v1630_v28  ;;  %v1566_v10 = vmul.u32 %v3458_v16, %v1550_v54  ;;  %vm1568_vm15 = vc.u32 %v3483_v51, %v3486_v20 }
 0x3b0   : > { %v1569_v7 = vadd.s32 1, %v3487_v35  ;;  %v1640_v50 = vor.u32 %v1639_v48, %v1638_v46  ;;  %v1643_v12 = vor.u32 %v1642_v14, %v1641_v18  ;;  %vm1647_vm0 = vcmp.lt.s32.totalorder %v1628_v40, 1 }
 0x3b1   : > { %v1646_v24 = vor.u32 %v1645_v36, %v1644_v4  ;;  %vm1650_vm1 = vcmp.lt.s32.totalorder %v1628_v40, 4  ;;  %v1631_v62 = vshrl.u32 %v2602_v15, %v1630_v28  ;;  %v1655_v25 = vsel %vm1647_vm0, %v1634_v47, %v1637_v41 }
 0x3b2   : > { %v1570_v0 = vsel %vm1568_vm15, %v1569_v7, %v3487_v35  ;;  %v1652_v57 = vsel %vm1650_vm1, %v1640_v50, 2102212464  ;;  %vm1649_vm2 = vcmp.lt.s32.totalorder %v1628_v40, 3  ;;  %v1656_v23 = vsel %vm1650_vm1, %v1643_v12, 920167782 }
 0x3b3   : > { %v1571_v11 = vadd.s32 %v1570_v0, %v1566_v10  ;;  %v1659_v16 = vsel %vm1647_vm0, %v1637_v41, %v1640_v50  ;;  %vm1648_vm3 = vcmp.lt.s32.totalorder %v1628_v40, 2  ;;  %v1651_v44 = vsel %vm1647_vm0, %v1631_v62, %v1634_v47 }
 0x3b4   : > { %v1657_v43 = vsel %vm1649_vm2, %v1640_v50, %v1656_v23  ;;  %v1660_v3 = vsel %vm1650_vm1, %v1646_v24, 1326507024  ;;  %v1653_v37 = vsel %vm1649_vm2, %v1637_v41, %v1652_v57  ;;  %vm1603_vm0 = vweird.f32 %v3383_v1 }
 0x3b5   : > { %v1572_v29 = vadd.s32 536870912, %v1571_v11  ;;  %v1658_v13 = vsel %vm1648_vm3, %v1655_v25, %v1657_v43  ;;  %v1661_v22 = vsel %vm1649_vm2, %v1643_v12, %v1660_v3  ;;  %v1654_v38 = vsel %vm1648_vm3, %v1651_v44, %v1653_v37 }
 0x3b6   : > { %v1662_v58 = vsel %vm1648_vm3, %v1659_v16, %v1661_v22  ;;  %v3507_v60 = vmul.u32.u64.low %v3471_v56, %v1658_v13  ;;  %v3508_v55 = vmul.u32.u64.high %v3471_v56, %v1658_v13, %v3507_v60  ;;  %v1670_v5 = vmul.u32 %v3471_v56, %v1654_v38 }
 0x3b7   : > { %v1573_v28 = vshrl.u32 %v1572_v29, 30  ;;  %v3511_v63 = vmul.u32.u64.low %v3471_v56, %v1662_v58  ;;  %v3512_v52 = vmul.u32.u64.high %v3471_v56, %v1662_v58, %v3511_v63  ;;  %vm1617_vm3 = vcmp.lt.s32.totalorder %v3386_v33, 0 }
 0x3b8   : > { %v1673_v45 = vadd.s32 1, %v3508_v55 }
 0x3b9   : > { %v1574_v2 = vshll.u32 %v1573_v28, 30  ;;  %vm1672_vm4 = vc.u32 %v3512_v52, %v3507_v60  ;;  %v1597_v32 = vsub.s32 4, %v1573_v28  ;;  %v1671_v44 = vadd.s32 %v3507_v60, %v3512_v52 }
 0x3ba   : > { %v1502_v61 = vpop.f32.mrb[6].mxu0  ;;  %v1674_v53 = vsel %vm1672_vm4, %v1673_v45, %v3508_v55 }
 0x3bb   : > { %v3516_v42 = vadd.f32 %v1502_v61, %v2998_v49  ;;  %v1504_v6 = vpop.f32.mrb[7].mxu0  ;;  %v1575_v9 = vsub.s32 %v1571_v11, %v1574_v2  ;;  %v1675_v40 = vadd.s32 %v1674_v53, %v1670_v5  ;;  %v1598_v4 = vsel %vm1513_vm5, %v1597_v32, %v1573_v28 }
 0x3bc   : > { %v3525_v34 = vadd.f32 %v1504_v6, %v3002_v31  ;;  %v1927_v31 = vmul.f32 0.35, %v3365_v39  ;;  %v1567_v39 = vadd.s32 %v3486_v20, %v3483_v51  ;;  %v1600_v57 = vsel %vm3543_vm6, 0, %v1598_v4 }
 0x3bd   : > { %v3522_v35 = vmul.f32 1.5, %v3516_v42  ;;  %v1577_v54 = vsub.s32 0, %v1575_v9  ;;  %v1676_v48 = vadd.s32 536870912, %v1675_v40  ;;  %v3555_v3 = vadd.s32 3, %v1600_v57 }
 0x3be   : > { %v3532_v41 = vmul.f32 1.5, %v3525_v34  ;;  %2534 = vtanh.f32 %v1927_v31 }
 0x3bf   : > { %v1719_v49 = vand.u32 2147483647, %v3522_v35  ;;  %v1722_v47 = vand.u32 2139095040, %v3522_v35  ;;  %v2178_v46 = vmin.u32 %v1577_v54, %v1575_v9  ;;  %v3538_v36 = vshrl.u32 %v1676_v48, 30 }
 0x3c0   : > { %v1826_v50 = vand.u32 2139095040, %v3532_v41 }
 0x3c1   : > { %v1723_v56 = vshrl.u32 %v1722_v47, 23  ;;  %v1726_v14 = vand.u32 8388607, %v1719_v49  ;;  %v1579_v18 = vclz %v2178_v46  ;;  %v1678_v24 = vshll.u32 %v3538_v36, 30 }
 0x3c2   : > { %v1827_v8 = vshrl.u32 %v1826_v50, 23 }
 0x3c3   : > { %v2185_v10 = vadd.s32 4294967169, %v1723_v56  ;;  %v2179_v7 = vadd.s32 4294967294, %v1579_v18  ;;  %v1727_v0 = vor.u32 8388608, %v1726_v14  ;;  %v3552_v11 = vsub.s32 %v1675_v40, %v1678_v24 }
 0x3c4   : > { %v2189_v38 = vadd.s32 4294967169, %v1827_v8 }
 0x3c5   : > { %v1729_v62 = vadd.s32 1, %v2185_v10  ;;  %vm2180_vm7 = vcmp.lt.s32.totalorder %v2179_v7, 0  ;;  %v1681_v29 = vsub.s32 0, %v3552_v11  ;;  %v3558_v20 = vshll.u32 %v1727_v0, 8 }
 0x3c6   : > { %v1582_v25 = vsel %vm2180_vm7, 0, %v2179_v7 }
 0x3c7   : > { %vm1730_vm8 = vcmp.gt.s32.totalorder %v1729_v62, 0  ;;  %v1583_v23 = vsub.s32 32, %v1582_v25  ;;  %v1587_v16 = vsub.s32 4294967266, %v1582_v25  ;;  %v1584_v37 = vshll.u32 %v1575_v9, %v1582_v25 }
 0x3c8   : > { %v1731_v43 = vsel %vm1730_vm8, %v1729_v62, 0  ;;  %v2182_v55 = vmin.u32 %v1681_v29, %v3552_v11  ;;  %v2535_v14 = vpop.eup %2534 }
 0x3c9   : > { %v1733_v51 = vand.u32 31, %v1731_v43  ;;  %v1585_v13 = vshrl.u32 %v1567_v39, %v1583_v23  ;;  %v1588_v22 = vadd.s32 127, %v1587_v16  ;;  %v3560_v58 = vshrl.u32 %v1731_v43, 5 }
 0x3ca   : > { %v1683_v45 = vclz %v2182_v55 }
 0x3cb   : > { %v1734_v28 = vsub.s32 32, %v1733_v51  ;;  %v1736_v63 = vshll.u32 %v2602_v15, %v1733_v51  ;;  %v1586_v60 = vor.u32 %v1585_v13, %v1584_v37  ;;  %v1589_v52 = vshll.u32 %v1588_v22, 23 }
 0x3cc   : > { %v1739_v2 = vshll.u32 %v2603_v17, %v1733_v51  ;;  %v1742_v61 = vshll.u32 %v2604_v19, %v1733_v51  ;;  %v1745_v5 = vshll.u32 %v2605_v21, %v1733_v51  ;;  %v2183_v47 = vadd.s32 4294967294, %v1683_v45 }
 0x3cd   : > { %v1737_v6 = vshrl.u32 %v2603_v17, %v1734_v28  ;;  %v1740_v9 = vshrl.u32 %v2604_v19, %v1734_v28  ;;  %v1590_v53 = vor.u32 4788187, %v1589_v52  ;;  %v1593_v54 = vcvt.s32.f32 %v1586_v60 }
 0x3ce   : > { %v1743_v40 = vshrl.u32 %v2605_v21, %v1734_v28  ;;  %v1746_v32 = vshrl.u32 %v2606_v26, %v1734_v28  ;;  %v1748_v56 = vshll.u32 %v2606_v26, %v1733_v51  ;;  %v1749_v10 = vshrl.u32 %v2607_v30, %v1734_v28 }
 0x3cf   : > { %v1738_v46 = vor.u32 %v1737_v6, %v1736_v63  ;;  %v1741_v48 = vor.u32 %v1740_v9, %v1739_v2  ;;  %v1591_v18 = vand.u32 2147483647, %v1590_v53  ;;  %vm2184_vm9 = vcmp.lt.s32.totalorder %v2183_v47, 0 }
 0x3d0   : > { %v1744_v31 = vor.u32 %v1743_v40, %v1742_v61  ;;  %v1747_v4 = vor.u32 %v1746_v32, %v1745_v5  ;;  %v1735_v7 = vshrl.u32 %v2602_v15, %v1734_v28  ;;  %vm1751_vm10 = vcmp.lt.s32.totalorder %v3560_v58, 1 }
 0x3d1   : > { %vm1752_vm11 = vcmp.lt.s32.totalorder %v3560_v58, 2  ;;  %v1594_v50 = vmul.f32 %v1593_v54, %v1591_v18  ;;  %v1686_v24 = vsel %vm2184_vm9, 0, %v2183_v47  ;;  %v1750_v0 = vor.u32 %v1749_v10, %v1748_v56 }
 0x3d2   : > { %vm1753_vm12 = vcmp.lt.s32.totalorder %v3560_v58, 3  ;;  %v1687_v62 = vsub.s32 32, %v1686_v24  ;;  %v1688_v39 = vshll.u32 %v3552_v11, %v1686_v24  ;;  %v1691_v57 = vsub.s32 4294967266, %v1686_v24 }
 0x3d3   : > { %vm1754_vm13 = vcmp.lt.s32.totalorder %v3560_v58, 4  ;;  %v1595_v25 = vxor.u32 2147483648, %v1594_v50  ;;  %v1759_v23 = vsel %vm1751_vm10, %v1738_v46, %v1741_v48  ;;  %v1755_v51 = vsel %vm1751_vm10, %v1735_v7, %v1738_v46 }
 0x3d4   : > { %v1756_v8 = vsel %vm1754_vm13, %v1744_v31, 2102212464  ;;  %v1760_v16 = vsel %vm1754_vm13, %v1747_v4, 920167782  ;;  %v1689_v43 = vshrl.u32 %v1671_v44, %v1687_v62  ;;  %v1692_v29 = vadd.s32 127, %v1691_v57 }
 0x3d5   : > { %v1761_v11 = vsel %vm1753_vm12, %v1744_v31, %v1760_v16  ;;  %v1596_v37 = vsel %vm1513_vm5, %v1595_v25, %v1594_v50  ;;  %v1757_v13 = vsel %vm1753_vm12, %v1741_v48, %v1756_v8  ;;  %v1763_v55 = vsel %vm1751_vm10, %v1741_v48, %v1744_v31 }
 0x3d6   : > { %v1762_v22 = vsel %vm1752_vm11, %v1759_v23, %v1761_v11  ;;  %v1599_v44 = vsel %vm3543_vm6, %v3383_v1, %v1596_v37  ;;  %v1690_v28 = vor.u32 %v1689_v43, %v1688_v39  ;;  %v1693_v63 = vshll.u32 %v1692_v29, 23 }
 0x3d7   : > { %v1764_v60 = vsel %vm1754_vm13, %v1750_v0, 1326507024  ;;  %2536 = vcosq.f32 %v1599_v44  ;;  %v3605_v2 = vmul.u32.u64.low %v3558_v20, %v1762_v22  ;;  %v3606_v61 = vmul.u32.u64.high %v3558_v20, %v1762_v22, %v3605_v2 }
 0x3d8   : > { %v1765_v52 = vsel %vm1753_vm12, %v1747_v4, %v1764_v60  ;;  %2538 = vsinq.f32 %v1599_v44  ;;  %v1694_v45 = vor.u32 4788187, %v1693_v63  ;;  %v1823_v6 = vand.u32 2147483647, %v3532_v41 }
 0x3d9   : > { %v1766_v12 = vsel %vm1752_vm11, %v1763_v55, %v1765_v52  ;;  %v1758_v54 = vsel %vm1752_vm11, %v1755_v51, %v1757_v13  ;;  %v1833_v40 = vadd.s32 1, %v2189_v38  ;;  %v1605_v32 = vand.u32 3, %v3555_v3 }
 0x3da   : > { %v3613_v9 = vmul.u32.u64.low %v3558_v20, %v1766_v12  ;;  %v3614_v5 = vmul.u32.u64.high %v3558_v20, %v1766_v12, %v3613_v9  ;;  %v1695_v53 = vand.u32 2147483647, %v1694_v45  ;;  %v1935_v47 = vadd.f32 1.0, %v2535_v14 }
 0x3db   : > { %v1697_v46 = vcvt.s32.f32 %v1690_v28  ;;  %v1777_v48 = vadd.s32 1, %v3606_v61  ;;  %v1830_v56 = vand.u32 8388607, %v1823_v6  ;;  %vm1834_vm14 = vcmp.gt.s32.totalorder %v1833_v40, 0 }
 0x3dc   : > { %v1774_v31 = vmul.u32 %v3558_v20, %v1758_v54  ;;  %vm1776_vm15 = vc.u32 %v3614_v5, %v3605_v2  ;;  %v1835_v4 = vsel %vm1834_vm14, %v1833_v40, 0  ;;  %v1928_v58 = vmul.f32 0.35, %v3374_v59 }
 0x3dd   : > { %v1698_v18 = vmul.f32 %v1697_v46, %v1695_v53  ;;  %v1778_v3 = vsel %vm1776_vm15, %v1777_v48, %v3606_v61  ;;  %v1837_v38 = vand.u32 31, %v1835_v4  ;;  %vm1606_vm1 = vcmp.lt.s32.totalorder %v1605_v32, 2 }
 0x3de   : > { %vm1607_vm2 = vcmp.eq.s32.totalorder %v1605_v32, 0  ;;  %v1939_v14 = vmul.f32 0.5, %v1935_v47  ;;  %v1779_v10 = vadd.s32 %v1778_v3, %v1774_v31  ;;  %vm1610_vm4 = vcmp.eq.s32.totalorder %v1605_v32, 2 }
 0x3df   : > { %v1831_v7 = vor.u32 8388608, %v1830_v56  ;;  %v1838_v20 = vsub.s32 32, %v1837_v38  ;;  %v1701_v50 = vsub.s32 4, %v3538_v36  ;;  %v1699_v0 = vxor.u32 2147483648, %v1698_v18 }
 0x3e0   : > { %v1780_v62 = vadd.s32 536870912, %v1779_v10  ;;  %v3630_v39 = vshrl.u32 %v1835_v4, 5  ;;  %v1840_v59 = vshll.u32 %v2602_v15, %v1837_v38  ;;  %v1843_v23 = vshll.u32 %v2603_v17, %v1837_v38 }
 0x3e1   : > { %v2537_v24 = vpop.eup %2536  ;;  %v1841_v8 = vshrl.u32 %v2603_v17, %v1838_v20  ;;  %v1844_v16 = vshrl.u32 %v2604_v19, %v1838_v20  ;;  %v1847_v51 = vshrl.u32 %v2605_v21, %v1838_v20  ;;  %v1850_v11 = vshrl.u32 %v2606_v26, %v1838_v20 }
 0x3e2   : > { %v2539_v57 = vpop.eup %2538  ;;  %v1611_v25 = vxor.u32 2147483648, %v2537_v24  ;;  %v3636_v29 = vshrl.u32 %v1780_v62, 30  ;;  %v1846_v13 = vshll.u32 %v2604_v19, %v1837_v38  ;;  %v1849_v22 = vshll.u32 %v2605_v21, %v1837_v38 }
 0x3e3   : > { %v1608_v43 = vxor.u32 2147483648, %v2539_v57  ;;  %v1853_v55 = vshrl.u32 %v2607_v30, %v1838_v20  ;;  %v1842_v28 = vor.u32 %v1841_v8, %v1840_v59  ;;  %v1852_v63 = vshll.u32 %v2606_v26, %v1837_v38 }
 0x3e4   : > { %v1612_v37 = vsel %vm1610_vm4, %v1611_v25, %v2539_v57  ;;  %v1782_v17 = vshll.u32 %v3636_v29, 30  ;;  %v1845_v52 = vor.u32 %v1844_v16, %v1843_v23  ;;  %v1848_v61 = vor.u32 %v1847_v51, %v1846_v13 }
 0x3e5   : > { %v1609_v44 = vsel %vm1607_vm2, %v2537_v24, %v1608_v43  ;;  %v1851_v45 = vor.u32 %v1850_v11, %v1849_v22  ;;  %2540 = vtanh.f32 %v1928_v58  ;;  %vm3654_vm5 = vcmp.le.f32.partialorder %v1615_v27, 0.7853982 }
 0x3e6   : > { %v1613_v60 = vsel %vm1606_vm1, %v1609_v44, %v1612_v37  ;;  %v3650_v19 = vsub.s32 %v1779_v10, %v1782_v17  ;;  %v1854_v26 = vor.u32 %v1853_v55, %v1852_v63  ;;  %v1871_v9 = vshll.u32 %v1831_v7, 8 }
 0x3e7   : > { %v1614_v12 = vsel %vm1603_vm0, nan, %v1613_v60  ;;  %v1702_v53 = vsel %vm1617_vm3, %v1701_v50, %v3538_v36  ;;  %v1700_v1 = vsel %vm1617_vm3, %v1699_v0, %v1698_v18  ;;  %vm1855_vm6 = vcmp.lt.s32.totalorder %v3630_v39, 1 }
 0x3e8   : > { %v3658_v30 = vmul.f32 %v1939_v14, %v1614_v12  ;;  %v1785_v54 = vsub.s32 0, %v3650_v19  ;;  %vm1858_vm7 = vcmp.lt.s32.totalorder %v3630_v39, 4  ;;  %vm1857_vm8 = vcmp.lt.s32.totalorder %v3630_v39, 3 }
 0x3e9   : > { %v1860_v27 = vsel %vm1858_vm7, %v1848_v61, 2102212464  ;;  %v1863_v40 = vsel %vm1855_vm6, %v1842_v28, %v1845_v52  ;;  %v1864_v32 = vsel %vm1858_vm7, %v1851_v45, 920167782  ;;  %v1839_v46 = vshrl.u32 %v2602_v15, %v1838_v20 }
 0x3ea   : > { %v2186_v47 = vmin.u32 %v1785_v54, %v3650_v19  ;;  %vm1856_vm9 = vcmp.lt.s32.totalorder %v3630_v39, 2  ;;  %v1865_v36 = vsel %vm1857_vm8, %v1848_v61, %v1864_v32  ;;  %v1867_v56 = vsel %vm1855_vm6, %v1845_v52, %v1848_v61 }
 0x3eb   : > { %v1866_v48 = vsel %vm1856_vm9, %v1863_v40, %v1865_v36  ;;  %v1868_v18 = vsel %vm1858_vm7, %v1854_v26, 1326507024  ;;  %v1703_v31 = vsel %vm3654_vm5, %v3386_v33, %v1700_v1  ;;  %v1859_v58 = vsel %vm1855_vm6, %v1839_v46, %v1842_v28 }
 0x3ec   : > { %v1787_v4 = vclz %v2186_v47  ;;  %v1861_v3 = vsel %vm1857_vm8, %v1845_v52, %v1860_v27  ;;  %v1869_v38 = vsel %vm1857_vm8, %v1851_v45, %v1868_v18  ;;  %2542 = vcosq.f32 %v1703_v31 }
 0x3ed   : > { %v3677_v14 = vmul.u32.u64.low %v1871_v9, %v1866_v48  ;;  %v3678_v10 = vmul.u32.u64.high %v1871_v9, %v1866_v48, %v3677_v14  ;;  %v1870_v7 = vsel %vm1856_vm9, %v1867_v56, %v1869_v38  ;;  %v1704_v20 = vsel %vm3654_vm5, 0, %v1702_v53 }
 0x3ee   : > { %v2187_v15 = vadd.s32 4294967294, %v1787_v4  ;;  %2544 = vsinq.f32 %v1703_v31  ;;  %v3684_v50 = vmul.u32.u64.low %v1871_v9, %v1870_v7  ;;  %v3685_v24 = vmul.u32.u64.high %v1871_v9, %v1870_v7, %v3684_v50 }
 0x3ef   : > { %v2541_v0 = vpop.eup %2540  ;;  %v1862_v62 = vsel %vm1856_vm9, %v1859_v58, %v1861_v3  ;;  %v1881_v57 = vadd.s32 1, %v3678_v10  ;;  %v1708_v25 = vadd.s32 3, %v1704_v20  ;;  %v1775_v13 = vadd.s32 %v3605_v2, %v3614_v5 }
 0x3f0   : > { %vm2188_vm10 = vcmp.lt.s32.totalorder %v2187_v15, 0  ;;  %v1878_v23 = vmul.u32 %v1871_v9, %v1862_v62  ;;  %vm1880_vm11 = vc.u32 %v3685_v24, %v3677_v14  ;;  %v1936_v17 = vadd.f32 1.0, %v2541_v0 }
 0x3f1   : > { %v1790_v59 = vsel %vm2188_vm10, 0, %v2187_v15  ;;  %v1882_v51 = vsel %vm1880_vm11, %v1881_v57, %v3678_v10  ;;  %v1709_v37 = vand.u32 3, %v1708_v25  ;;  %vm1707_vm15 = vweird.f32 %v3386_v33 }
 0x3f2   : > { %v1795_v8 = vsub.s32 4294967266, %v1790_v59  ;;  %v1791_v16 = vsub.s32 32, %v1790_v59  ;;  %v1883_v11 = vadd.s32 %v1882_v51, %v1878_v23  ;;  %v1792_v61 = vshll.u32 %v3650_v19, %v1790_v59 }
 0x3f3   : > { %vm1714_vm12 = vcmp.eq.s32.totalorder %v1709_v37, 2  ;;  %vm1711_vm13 = vcmp.eq.s32.totalorder %v1709_v37, 0  ;;  %vm1710_vm14 = vcmp.lt.s32.totalorder %v1709_v37, 2  ;;  %v1940_v5 = vmul.f32 0.5, %v1936_v17 }
 0x3f4   : > { %v1796_v43 = vadd.s32 127, %v1795_v8  ;;  %v1884_v55 = vadd.s32 536870912, %v1883_v11  ;;  %v1793_v28 = vshrl.u32 %v1775_v13, %v1791_v16  ;;  %vm1721_vm1 = vcmp.lt.s32.totalorder %v3522_v35, 0 }
 0x3f5   : > { %v1879_v33 = vadd.s32 %v3677_v14, %v3685_v24  ;;  %vm3703_vm2 = vcmp.le.f32.partialorder %v1719_v49, 0.7853982  ;;  %v1805_v7 = vsub.s32 4, %v3636_v29  ;;  %v1930_v62 = vmul.f32 0.35, %v3525_v34 }
 0x3f6   : > { %v1797_v22 = vshll.u32 %v1796_v43, 23  ;;  %v2543_v39 = vpop.eup %2542  ;;  %v1885_v60 = vshrl.u32 %v1884_v55, 30  ;;  %v1794_v9 = vor.u32 %v1793_v28, %v1792_v61  ;;  %v1929_v57 = vmul.f32 0.35, %v3516_v42 }
 0x3f7   : > { %v1715_v63 = vxor.u32 2147483648, %v2543_v39  ;;  %v1806_v49 = vsel %vm1721_vm1, %v1805_v7, %v3636_v29  ;;  %vm1825_vm3 = vcmp.lt.s32.totalorder %v3532_v41, 0  ;;  %vm1824_vm4 = vcmp.le.f32.partialorder %v1823_v6, 0.7853982 }
 0x3f8   : > { %v2545_v44 = vpop.eup %2544  ;;  %v1798_v45 = vor.u32 4788187, %v1797_v22  ;;  %v1886_v21 = vshll.u32 %v1885_v60, 30  ;;  %v1801_v32 = vcvt.s32.f32 %v1794_v9  ;;  %v1909_v59 = vsub.s32 4, %v1885_v60 }
 0x3f9   : > { %v1712_v52 = vxor.u32 2147483648, %v2545_v44  ;;  %v1716_v12 = vsel %vm1714_vm12, %v1715_v63, %v2545_v44  ;;  %v1808_v8 = vsel %vm3703_vm2, 0, %v1806_v49  ;;  %vm1811_vm10 = vweird.f32 %v3522_v35 }
 0x3fa   : > { %v1887_v53 = vsub.s32 %v1883_v11, %v1886_v21  ;;  %v1799_v54 = vand.u32 2147483647, %v1798_v45  ;;  %v1910_v16 = vsel %vm1825_vm3, %v1909_v59, %v1885_v60  ;;  %v1812_v43 = vadd.s32 3, %v1808_v8 }
 0x3fb   : > { %v1713_v26 = vsel %vm1711_vm13, %v2543_v39, %v1712_v52  ;;  %v1912_v51 = vsel %vm1824_vm4, 0, %v1910_v16  ;;  %vm1915_vm12 = vweird.f32 %v3532_v41  ;;  %vm2061_vm13 = vcmask 130048  }
 0x3fc   : > { %v1717_v2 = vsel %vm1710_vm14, %v1713_v26, %v1716_v12  ;;  %v1889_v40 = vsub.s32 0, %v1887_v53  ;;  %v1802_v19 = vmul.f32 %v1801_v32, %v1799_v54  ;;  %v1813_v11 = vand.u32 3, %v1812_v43  ;;  %v2193_v32 = vld [vmem:[%s3741_s6] ss:$0 sm:$0xff] }
 0x3fd   : > { %v1718_v1 = vsel %vm1707_vm15, nan, %v1717_v2  ;;  %v1916_v37 = vadd.s32 3, %v1912_v51 }
 0x3fe   : > { %v1944_v27 = vmul.f32 %v1940_v5, %v1718_v1  ;;  %v2190_v47 = vmin.u32 %v1889_v40, %v1887_v53  ;;  %v1803_v48 = vxor.u32 2147483648, %v1802_v19  ;;  %vm1815_vm5 = vcmp.eq.s32.totalorder %v1813_v11, 0 }
 0x3ff   : > { %vm1818_vm6 = vcmp.eq.s32.totalorder %v1813_v11, 2  ;;  %v1917_v55 = vand.u32 3, %v1916_v37  ;;  %vm1814_vm7 = vcmp.lt.s32.totalorder %v1813_v11, 2 }
 0x400   : > { %2050 = vmatprep.mubr.f32.mxu0 %v1944_v27  ;;  %v1891_v46 = vclz %v2190_v47  ;;  %v1804_v4 = vsel %vm1721_vm1, %v1803_v48, %v1802_v19 }
 0x401   : > { %2051 = vmatmul.mubr.f32.vlgmr.msra.gmra.mrb[8].mxu0 %v3658_v30  ;;  %v1807_v10 = vsel %vm3703_vm2, %v3522_v35, %v1804_v4  ;;  %vm1922_vm8 = vcmp.eq.s32.totalorder %v1917_v55, 2  ;;  %vm1919_vm9 = vcmp.eq.s32.totalorder %v1917_v55, 0  ;;  %vm1918_vm11 = vcmp.lt.s32.totalorder %v1917_v55, 2 }
 0x402   : > { %v2191_v36 = vadd.s32 4294967294, %v1891_v46  ;;  %2546 = vcosq.f32 %v1807_v10 }
 0x403   : > { %2548 = vsinq.f32 %v1807_v10 }
 0x404   : > { %vm2192_vm0 = vcmp.lt.s32.totalorder %v2191_v36, 0  ;;  %2550 = vtanh.f32 %v1930_v62 }
 0x405   : > { %v1894_v56 = vsel %vm2192_vm0, 0, %v2191_v36  ;;  %2552 = vtanh.f32 %v1929_v57 }
 0x406   : > { %v1895_v18 = vsub.s32 32, %v1894_v56  ;;  %v1899_v31 = vsub.s32 4294967266, %v1894_v56  ;;  %v1896_v58 = vshll.u32 %v1887_v53, %v1894_v56 }
 0x408   : > { %v1897_v3 = vshrl.u32 %v1879_v33, %v1895_v18  ;;  %v1900_v38 = vadd.s32 127, %v1899_v31 }
 0x40a   : > { %v1898_v15 = vor.u32 %v1897_v3, %v1896_v58  ;;  %v1901_v14 = vshll.u32 %v1900_v38, 23 }
 0x40c   : > { %v1902_v20 = vor.u32 4788187, %v1901_v14  ;;  %v1905_v24 = vcvt.s32.f32 %v1898_v15  ;;  %v2547_v34 = vpop.eup %2546 }
 0x40d   : > { %v2549_v42 = vpop.eup %2548  ;;  %v1819_v22 = vxor.u32 2147483648, %v2547_v34 }
 0x40e   : > { %v1903_v50 = vand.u32 2147483647, %v1902_v20  ;;  %v1816_v13 = vxor.u32 2147483648, %v2549_v42  ;;  %v2551_v39 = vpop.eup %2550 }
 0x40f   : > { %v2553_v44 = vpop.eup %2552  ;;  %v1820_v17 = vsel %vm1818_vm6, %v1819_v22, %v2549_v42  ;;  %v1938_v60 = vadd.f32 1.0, %v2551_v39 }
 0x410   : > { %v1906_v0 = vmul.f32 %v1905_v24, %v1903_v50  ;;  %v1817_v6 = vsel %vm1815_vm5, %v2547_v34, %v1816_v13  ;;  %v1937_v45 = vadd.f32 1.0, %v2553_v44 }
 0x411   : > { %v1821_v61 = vsel %vm1814_vm7, %v1817_v6, %v1820_v17  ;;  %v1942_v5 = vmul.f32 0.5, %v1938_v60 }
 0x412   : > { %v1907_v25 = vxor.u32 2147483648, %v1906_v0  ;;  %v1822_v9 = vsel %vm1811_vm10, nan, %v1821_v61  ;;  %v1941_v53 = vmul.f32 0.5, %v1937_v45 }
 0x414   : > { %v1908_v23 = vsel %vm1825_vm3, %v1907_v25, %v1906_v0  ;;  %v1945_v27 = vmul.f32 %v1941_v53, %v1822_v9 }
 0x415   : > { %v1911_v29 = vsel %vm1824_vm4, %v3532_v41, %v1908_v23 }
 0x416   : > { %2554 = vcosq.f32 %v1911_v29 }
 0x417   : > { %2556 = vsinq.f32 %v1911_v29 }
 0x420   : > { %v2555_v28 = vpop.eup %2554 }
 0x421   : > { %v2557_v63 = vpop.eup %2556  ;;  %v1923_v52 = vxor.u32 2147483648, %v2555_v28 }
 0x422   : > { %v1920_v12 = vxor.u32 2147483648, %v2557_v63 }
 0x423   : > { %v1924_v21 = vsel %vm1922_vm8, %v1923_v52, %v2557_v63 }
 0x424   : > { %v1921_v26 = vsel %vm1919_vm9, %v2555_v28, %v1920_v12 }
 0x425   : > { %v1925_v2 = vsel %vm1918_vm11, %v1921_v26, %v1924_v21 }
 0x426   : > { %v1926_v1 = vsel %vm1915_vm12, nan, %v1925_v2 }
 0x427   : > { %v1946_v54 = vmul.f32 %v1942_v5, %v1926_v1 }
 0x429   : > { %2055 = vmatprep.mubr.f32.mxu1 %v1946_v54 }
 0x42a   : > { %2056 = vmatmul.mubr.f32.vlgmr.msra.gmra.mrb[4].mxu1 %v1945_v27 }
 0x4d4   : > { %v2228_v40 = vpop.f32.mrb[8].mxu0 }
 0x4d5   : > { %v2229_v35 = vpop.f32.mrb[9].mxu0 }
 0x4d6   : > { %v2230_v47 = vadd.f32 %v2229_v35, %v2228_v40 }
 0x4d8   : > { %v2053_v41 = vadd.f32 %v2230_v47, %v2193_v32 }
 0x4da   : > { %2062 = vst.msk [vmem:[%s295_s19] sm:$0xff] %vm2061_vm13, %v2053_v41 }
 0x4fd   : > { %v2231_v19 = vpop.f32.mrb[4].mxu1 }
 0x4fe   : > { %v2232_v46 = vpop.f32.mrb[5].mxu1 }
 0x4ff   : > { %v2233_v36 = vadd.f32 %v2232_v46, %v2231_v19 }
 0x501   : > { %v2058_v48 = vadd.f32 %v2233_v36, %v2193_v32 }
 0x503   : > { %2063 = vst.msk [vmem:[%s295_s19 + $0x8] sm:$0xff] %vm2061_vm13, %v2058_v48 }
 0x504 PF: > { %s18_s24 = sadd.s32 1, %s2596_s24  }
 0x505   : > { %p15_p3 = scmp.ge.s32.totalorder %s18_s24, 4  }
 0x507   :  { %17 = sbr.rel (!%p15_p3) target bundleno = 1 (0x1), region = 83 }
 0x50e   :  { %2086 = vsyncpa [#allocation3], 1 }
 0x50f   :  { %2088 = vsyncpa [#allocation3 + $0x1], 1 }

</bundles_post_ra>
